<compile_context>
chip_gen: v7x
topology: tpu7x:2x2x1
jax: 0.10.0
libtpu: 0.0.40
codegen_flags: <defaults>
</compile_context>

<pallas_src>
import functools

import jax
import jax.numpy as jnp
from jax.experimental import pallas as pl
from jax.experimental.pallas import tpu as pltpu

UPDATE_LR = 0.4       # args.update_lr
UPDATE_STEP = 5       # args.update_step

# dot_general dimension numbers:
#   contract-last: (N, D) . (M, D) over D -> (N, M)   (MXU-friendly, lane-dense)
#   row-col      : (N, M) . (M, C)        -> (N, C)
_DIMS_CONTRACT_LAST = (((1,), (1,)), ((), ()))
_DIMS_ROWCOL = (((1,), (0,)), ((), ()))


def _maml_kernel(xs_ref, ys_oh_ref, xq_ref, yq_oh_ref, w0T_ref, b0_ref,
                 out_ref, *, tasks_per_block, update_step, update_lr):
    w0T = w0T_ref[...]            # (C, D) bf16, lane-dense meta weights
    b0 = b0_ref[...]              # (1, C) f32 meta bias
    lane01 = jax.lax.broadcasted_iota(jnp.int32, (1, 2), 1)   # output packing

    ns = xs_ref.shape[1]
    lr_eff = jnp.float32(update_lr / ns)   # fold the 1/Ns of dCE/dlogits into lr

    for j in range(tasks_per_block):       # static unroll over tasks in block
        xs = xs_ref[j]                     # (Ns, D) bf16
        ys_oh = ys_oh_ref[j]               # (Ns, C) f32
        xq = xq_ref[j]                     # (Nq, D) bf16
        yq_oh = yq_oh_ref[j]               # (Nq, C) f32

        # ---- Gram-space precompute: the ONLY D-length contractions (4/task).
        l0s = jax.lax.dot_general(xs, w0T, _DIMS_CONTRACT_LAST,
                                  preferred_element_type=jnp.float32) + b0
        l0q = jax.lax.dot_general(xq, w0T, _DIMS_CONTRACT_LAST,
                                  preferred_element_type=jnp.float32) + b0
        gram = jax.lax.dot_general(xs, xs, _DIMS_CONTRACT_LAST,
                                   preferred_element_type=jnp.float32)   # (Ns,Ns)
        kq = jax.lax.dot_general(xq, xs, _DIMS_CONTRACT_LAST,
                                 preferred_element_type=jnp.float32)     # (Nq,Ns)
        gram_lr = gram * lr_eff            # pre-scale outside the serial chain
        kq_lr = kq * lr_eff

        # ---- inner SGD loop purely on (Ns, C) support logits; the fast
        #      weights themselves are never materialized.
        logits_s = l0s
        s_acc = jnp.zeros_like(ys_oh)      # sum of (un-normalized) dlogits
        for k in range(update_step):       # fully unrolled (5 iters)
            m = jnp.max(logits_s, axis=1, keepdims=True)
            e = jnp.exp(logits_s - m)
            inv = pl.reciprocal(jnp.sum(e, axis=1, keepdims=True), approx=True)
            dl = e * inv - ys_oh           # = Ns * dCE/dlogits
            s_acc = s_acc + dl
            if k + 1 < update_step:        # last logits update is never consumed
                gb = jnp.sum(dl, axis=0, keepdims=True)
                logits_s = logits_s - (
                    jax.lax.dot_general(gram_lr, dl, _DIMS_ROWCOL,
                                        preferred_element_type=jnp.float32)
                    + lr_eff * gb)

        # ---- query logits with the implicitly adapted fast weights.
        sb = jnp.sum(s_acc, axis=0, keepdims=True)                 # (1, C)
        logq = l0q - (jax.lax.dot_general(kq_lr, s_acc, _DIMS_ROWCOL,
                                          preferred_element_type=jnp.float32)
                      + lr_eff * sb)                                # (Nq, C)

        # cross-entropy (mean) via exact log-sum-exp
        mq = jnp.max(logq, axis=1, keepdims=True)
        lse = mq + jnp.log(jnp.sum(jnp.exp(logq - mq), axis=1, keepdims=True))
        nll = lse - jnp.sum(yq_oh * logq, axis=1, keepdims=True)    # (Nq, 1)
        loss = jnp.mean(nll, axis=(0, 1), keepdims=True)            # (1, 1)

        # accuracy: argmax (first-max index) via iota trick
        num_classes = logq.shape[1]
        ids = jax.lax.broadcasted_iota(jnp.int32, logq.shape, 1)
        pred = jnp.min(jnp.where(logq == mq, ids, num_classes),
                       axis=1, keepdims=True)                       # (Nq, 1) i32
        true_idx = jnp.sum(yq_oh * ids.astype(jnp.float32),
                           axis=1, keepdims=True)                   # (Nq, 1) f32
        correct = (pred.astype(jnp.float32) == true_idx).astype(jnp.float32)
        acc = jnp.mean(correct, axis=(0, 1), keepdims=True)          # (1, 1)

        # merged output row: lane 0 = loss_q, lane 1 = acc
        out_ref[pl.ds(j, 1), :] = jnp.where(lane01 == 0, loss, acc)


def maml_forward(x_spt, y_spt, x_qry, y_qry, w0, b0):
    """MAML forward.

    x_spt: [T, setsz, c, h, w] (or [setsz, c, h, w] for one task) float
    y_spt: [T, setsz] int                 (same layouts for the query set)
    w0:    [D, num_classes] float  (D = c*h*w),  b0: [1, num_classes]
    Returns per-task (loss_q, acc) of shape [T] (scalars for a single task).
    """
    single = (x_spt.ndim == 4)
    if single:
        x_spt, y_spt = x_spt[None], y_spt[None]
        x_qry, y_qry = x_qry[None], y_qry[None]

    t = x_spt.shape[0]
    ns, nq = x_spt.shape[1], x_qry.shape[1]
    d = x_spt.shape[2] * x_spt.shape[3] * x_spt.shape[4]
    c = w0.shape[1]

    # Grid blocking: two parallel grid steps when possible (one per v7x
    # TensorCore); otherwise a single step.  On single-TC v5e/v6e this keeps
    # per-step overhead to <=2 steps for the whole meta-batch.
    if t >= 2 and t % 2 == 0:
        gsteps, tpb = 2, t // 2
    else:
        gsteps, tpb = 1, t

    # bf16 MXU operands (in-kernel accumulation / softmax math stays f32).
    xs = x_spt.reshape(t, ns, d).astype(jnp.bfloat16)
    xq = x_qry.reshape(t, nq, d).astype(jnp.bfloat16)
    ys_oh = jax.nn.one_hot(y_spt, c, dtype=jnp.float32)      # (T, Ns, C)
    yq_oh = jax.nn.one_hot(y_qry, c, dtype=jnp.float32)      # (T, Nq, C)
    w0T = jnp.transpose(w0).astype(jnp.bfloat16)             # (C, D) lane-dense
    b0_ = b0.astype(jnp.float32).reshape(1, c)

    kernel = functools.partial(_maml_kernel, tasks_per_block=tpb,
                               update_step=UPDATE_STEP, update_lr=UPDATE_LR)

    grid_spec = pltpu.PrefetchScalarGridSpec(
        num_scalar_prefetch=0,
        grid=(gsteps,),
        in_specs=[
            pl.BlockSpec((tpb, ns, d), lambda i: (i, 0, 0)),   # xs block
            pl.BlockSpec((tpb, ns, c), lambda i: (i, 0, 0)),   # ys one-hot
            pl.BlockSpec((tpb, nq, d), lambda i: (i, 0, 0)),   # xq block
            pl.BlockSpec((tpb, nq, c), lambda i: (i, 0, 0)),   # yq one-hot
            pl.BlockSpec((c, d), lambda i: (0, 0)),            # meta W^T (resident)
            pl.BlockSpec((1, c), lambda i: (0, 0)),            # meta b  (resident)
        ],
        out_specs=pl.BlockSpec((None, tpb, 2), lambda i: (i, 0, 0)),
    )

    out = pl.pallas_call(
        kernel,
        out_shape=jax.ShapeDtypeStruct((gsteps, tpb, 2), jnp.float32),
        grid_spec=grid_spec,
        compiler_params=pltpu.CompilerParams(
            dimension_semantics=("parallel",)),
    )(xs, ys_oh, xq, yq_oh, w0T, b0_)

    out = out.reshape(t, 2)
    loss_q, acc = out[:, 0], out[:, 1]
    if single:
        return loss_q[0], acc[0]
    return loss_q, acc


if __name__ == "__main__":
    key = jax.random.PRNGKey(0)
    k1, k2, k3, k4, k5 = jax.random.split(key, 5)

    task_num, setsz, querysz = 4, 8, 8
    c_, h, w = 4, 16, 16
    num_classes = 8
    d = c_ * h * w

    x_spt = jax.random.normal(k1, (task_num, setsz, c_, h, w),
                              dtype=jnp.float32)
    x_qry = jax.random.normal(k2, (task_num, querysz, c_, h, w),
                              dtype=jnp.float32)
    y_spt = jax.random.randint(k3, (task_num, setsz), 0, num_classes,
                               dtype=jnp.int32)
    y_qry = jax.random.randint(k4, (task_num, querysz), 0, num_classes,
                               dtype=jnp.int32)

    # deterministic learner parameters (linear classifier: logits = x @ W + b)
    w0 = 0.02 * jax.random.normal(k5, (d, num_classes), dtype=jnp.float32)
    b0 = jnp.zeros((1, num_classes), dtype=jnp.float32)

    loss_q, acc = maml_forward(x_spt, y_spt, x_qry, y_qry, w0, b0)
    jax.block_until_ready((loss_q, acc))
    print("KERNEL_OK")
</pallas_src>

<mosaic_0001>
module attributes {stable_mosaic.version = 11 : i64} {
  func.func @_maml_kernel(%arg0: i32, %arg1: memref<2x8x1024xbf16, #tpu.memory_space<vmem>>, %arg2: memref<2x8x8xf32, #tpu.memory_space<vmem>>, %arg3: memref<2x8x1024xbf16, #tpu.memory_space<vmem>>, %arg4: memref<2x8x8xf32, #tpu.memory_space<vmem>>, %arg5: memref<8x1024xbf16, #tpu.memory_space<vmem>>, %arg6: memref<1x8xf32, #tpu.memory_space<vmem>>, %arg7: memref<1x2x2xf32, #tpu.memory_space<vmem>>) attributes {dimension_semantics = [#tpu.dimension_semantics<parallel>], iteration_bounds = array<i64: 2>, scalar_prefetch = 0 : i64, scratch_operands = 0 : i64, tpu.core_type = #tpu.core_type<tc>, window_params = [{transform_indices = @transform_0, window_bounds = array<i64: 2, 8, 1024>}, {transform_indices = @transform_1, window_bounds = array<i64: 2, 8, 8>}, {transform_indices = @transform_2, window_bounds = array<i64: 2, 8, 1024>}, {transform_indices = @transform_3, window_bounds = array<i64: 2, 8, 8>}, {pipeline_mode = #tpu.pipeline_mode<synchronous>, transform_indices = @transform_4, window_bounds = array<i64: 8, 1024>}, {pipeline_mode = #tpu.pipeline_mode<synchronous>, transform_indices = @transform_5, window_bounds = array<i64: 1, 8>}, {transform_indices = @transform_6, window_bounds = array<i64: 1, 2, 2>}]} {
    %c0 = arith.constant 0 : index
    %c0_0 = arith.constant 0 : index
    %0 = vector.load %arg5[%c0, %c0_0] : memref<8x1024xbf16, #tpu.memory_space<vmem>>, vector<8x1024xbf16>
    %c0_1 = arith.constant 0 : index
    %c0_2 = arith.constant 0 : index
    %1 = vector.load %arg6[%c0_1, %c0_2] : memref<1x8xf32, #tpu.memory_space<vmem>>, vector<1x8xf32>
    %2 = tpu.iota {dimensions = array<i32: 1>} : vector<1x2xi32>
    %c0_3 = arith.constant 0 : index
    %c0_4 = arith.constant 0 : index
    %c0_5 = arith.constant 0 : index
    %3 = vector.load %arg1[%c0_3, %c0_4, %c0_5] : memref<2x8x1024xbf16, #tpu.memory_space<vmem>>, vector<1x8x1024xbf16>
    %4 = vector.shape_cast %3 : vector<1x8x1024xbf16> to vector<8x1024xbf16>
    %c0_6 = arith.constant 0 : index
    %c0_7 = arith.constant 0 : index
    %c0_8 = arith.constant 0 : index
    %5 = vector.load %arg2[%c0_6, %c0_7, %c0_8] : memref<2x8x8xf32, #tpu.memory_space<vmem>>, vector<1x8x8xf32>
    %6 = vector.shape_cast %5 : vector<1x8x8xf32> to vector<8x8xf32>
    %c0_9 = arith.constant 0 : index
    %c0_10 = arith.constant 0 : index
    %c0_11 = arith.constant 0 : index
    %7 = vector.load %arg3[%c0_9, %c0_10, %c0_11] : memref<2x8x1024xbf16, #tpu.memory_space<vmem>>, vector<1x8x1024xbf16>
    %8 = vector.shape_cast %7 : vector<1x8x1024xbf16> to vector<8x1024xbf16>
    %c0_12 = arith.constant 0 : index
    %c0_13 = arith.constant 0 : index
    %c0_14 = arith.constant 0 : index
    %9 = vector.load %arg4[%c0_12, %c0_13, %c0_14] : memref<2x8x8xf32, #tpu.memory_space<vmem>>, vector<1x8x8xf32>
    %10 = vector.shape_cast %9 : vector<1x8x8xf32> to vector<8x8xf32>
    %cst = arith.constant dense<0.000000e+00> : vector<8x8xf32>
    %11 = tpu.matmul %4, %0, %cst {dimension_numbers = #tpu.dot_dimension_numbers<[1], [1], [0], [0], [0, 0, 1, 0], [], []>} : vector<8x1024xbf16>, vector<8x1024xbf16>, vector<8x8xf32> -> vector<8x8xf32>
    %12 = vector.broadcast %1 : vector<1x8xf32> to vector<8x8xf32>
    %13 = arith.addf %11, %12 : vector<8x8xf32>
    %cst_15 = arith.constant dense<0.000000e+00> : vector<8x8xf32>
    %14 = tpu.matmul %8, %0, %cst_15 {dimension_numbers = #tpu.dot_dimension_numbers<[1], [1], [0], [0], [0, 0, 1, 0], [], []>} : vector<8x1024xbf16>, vector<8x1024xbf16>, vector<8x8xf32> -> vector<8x8xf32>
    %15 = vector.broadcast %1 : vector<1x8xf32> to vector<8x8xf32>
    %16 = arith.addf %14, %15 : vector<8x8xf32>
    %cst_16 = arith.constant dense<0.000000e+00> : vector<8x8xf32>
    %17 = tpu.matmul %4, %4, %cst_16 {dimension_numbers = #tpu.dot_dimension_numbers<[1], [1], [0], [0], [0, 0, 1, 0], [], []>} : vector<8x1024xbf16>, vector<8x1024xbf16>, vector<8x8xf32> -> vector<8x8xf32>
    %cst_17 = arith.constant dense<0.000000e+00> : vector<8x8xf32>
    %18 = tpu.matmul %8, %4, %cst_17 {dimension_numbers = #tpu.dot_dimension_numbers<[1], [1], [0], [0], [0, 0, 1, 0], [], []>} : vector<8x1024xbf16>, vector<8x1024xbf16>, vector<8x8xf32> -> vector<8x8xf32>
    %cst_18 = arith.constant 5.000000e-02 : f32
    %19 = vector.broadcast %cst_18 : f32 to vector<8x8xf32>
    %20 = arith.mulf %17, %19 : vector<8x8xf32>
    %cst_19 = arith.constant 5.000000e-02 : f32
    %21 = vector.broadcast %cst_19 : f32 to vector<8x8xf32>
    %22 = arith.mulf %18, %21 : vector<8x8xf32>
    %cst_20 = arith.constant 0.000000e+00 : f32
    %23 = vector.broadcast %cst_20 : f32 to vector<8x8xf32>
    %cst_21 = arith.constant dense<0xFF800000> : vector<8xf32>
    %24 = vector.multi_reduction <maximumf>, %13, %cst_21 [1] : vector<8x8xf32> to vector<8xf32>
    %25 = vector.shape_cast %24 : vector<8xf32> to vector<8x1xf32>
    %26 = vector.broadcast %25 : vector<8x1xf32> to vector<8x8xf32>
    %27 = arith.subf %13, %26 : vector<8x8xf32>
    %28 = math.exp %27 : vector<8x8xf32>
    %cst_22 = arith.constant dense<0.000000e+00> : vector<8xf32>
    %29 = vector.multi_reduction <add>, %28, %cst_22 [1] : vector<8x8xf32> to vector<8xf32>
    %30 = vector.shape_cast %29 : vector<8xf32> to vector<8x1xf32>
    %31 = tpu.reciprocal %30 {approx = true} : vector<8x1xf32> -> vector<8x1xf32>
    %32 = vector.broadcast %31 : vector<8x1xf32> to vector<8x8xf32>
    %33 = arith.mulf %28, %32 : vector<8x8xf32>
    %34 = arith.subf %33, %6 : vector<8x8xf32>
    %35 = arith.addf %23, %34 : vector<8x8xf32>
    %cst_23 = arith.constant dense<0.000000e+00> : vector<8xf32>
    %36 = vector.multi_reduction <add>, %34, %cst_23 [0] : vector<8x8xf32> to vector<8xf32>
    %37 = vector.shape_cast %36 : vector<8xf32> to vector<1x8xf32>
    %cst_24 = arith.constant dense<0.000000e+00> : vector<8x8xf32>
    %38 = tpu.matmul %20, %34, %cst_24 {dimension_numbers = #tpu.dot_dimension_numbers<[1], [0], [0], [1], [0, 0, 1, 1], [], []>} : vector<8x8xf32>, vector<8x8xf32>, vector<8x8xf32> -> vector<8x8xf32>
    %cst_25 = arith.constant 5.000000e-02 : f32
    %39 = vector.broadcast %cst_25 : f32 to vector<1x8xf32>
    %40 = arith.mulf %39, %37 : vector<1x8xf32>
    %41 = vector.broadcast %40 : vector<1x8xf32> to vector<8x8xf32>
    %42 = arith.addf %38, %41 : vector<8x8xf32>
    %43 = arith.subf %13, %42 : vector<8x8xf32>
    %cst_26 = arith.constant dense<0xFF800000> : vector<8xf32>
    %44 = vector.multi_reduction <maximumf>, %43, %cst_26 [1] : vector<8x8xf32> to vector<8xf32>
    %45 = vector.shape_cast %44 : vector<8xf32> to vector<8x1xf32>
    %46 = vector.broadcast %45 : vector<8x1xf32> to vector<8x8xf32>
    %47 = arith.subf %43, %46 : vector<8x8xf32>
    %48 = math.exp %47 : vector<8x8xf32>
    %cst_27 = arith.constant dense<0.000000e+00> : vector<8xf32>
    %49 = vector.multi_reduction <add>, %48, %cst_27 [1] : vector<8x8xf32> to vector<8xf32>
    %50 = vector.shape_cast %49 : vector<8xf32> to vector<8x1xf32>
    %51 = tpu.reciprocal %50 {approx = true} : vector<8x1xf32> -> vector<8x1xf32>
    %52 = vector.broadcast %51 : vector<8x1xf32> to vector<8x8xf32>
    %53 = arith.mulf %48, %52 : vector<8x8xf32>
    %54 = arith.subf %53, %6 : vector<8x8xf32>
    %55 = arith.addf %35, %54 : vector<8x8xf32>
    %cst_28 = arith.constant dense<0.000000e+00> : vector<8xf32>
    %56 = vector.multi_reduction <add>, %54, %cst_28 [0] : vector<8x8xf32> to vector<8xf32>
    %57 = vector.shape_cast %56 : vector<8xf32> to vector<1x8xf32>
    %cst_29 = arith.constant dense<0.000000e+00> : vector<8x8xf32>
    %58 = tpu.matmul %20, %54, %cst_29 {dimension_numbers = #tpu.dot_dimension_numbers<[1], [0], [0], [1], [0, 0, 1, 1], [], []>} : vector<8x8xf32>, vector<8x8xf32>, vector<8x8xf32> -> vector<8x8xf32>
    %cst_30 = arith.constant 5.000000e-02 : f32
    %59 = vector.broadcast %cst_30 : f32 to vector<1x8xf32>
    %60 = arith.mulf %59, %57 : vector<1x8xf32>
    %61 = vector.broadcast %60 : vector<1x8xf32> to vector<8x8xf32>
    %62 = arith.addf %58, %61 : vector<8x8xf32>
    %63 = arith.subf %43, %62 : vector<8x8xf32>
    %cst_31 = arith.constant dense<0xFF800000> : vector<8xf32>
    %64 = vector.multi_reduction <maximumf>, %63, %cst_31 [1] : vector<8x8xf32> to vector<8xf32>
    %65 = vector.shape_cast %64 : vector<8xf32> to vector<8x1xf32>
    %66 = vector.broadcast %65 : vector<8x1xf32> to vector<8x8xf32>
    %67 = arith.subf %63, %66 : vector<8x8xf32>
    %68 = math.exp %67 : vector<8x8xf32>
    %cst_32 = arith.constant dense<0.000000e+00> : vector<8xf32>
    %69 = vector.multi_reduction <add>, %68, %cst_32 [1] : vector<8x8xf32> to vector<8xf32>
    %70 = vector.shape_cast %69 : vector<8xf32> to vector<8x1xf32>
    %71 = tpu.reciprocal %70 {approx = true} : vector<8x1xf32> -> vector<8x1xf32>
    %72 = vector.broadcast %71 : vector<8x1xf32> to vector<8x8xf32>
    %73 = arith.mulf %68, %72 : vector<8x8xf32>
    %74 = arith.subf %73, %6 : vector<8x8xf32>
    %75 = arith.addf %55, %74 : vector<8x8xf32>
    %cst_33 = arith.constant dense<0.000000e+00> : vector<8xf32>
    %76 = vector.multi_reduction <add>, %74, %cst_33 [0] : vector<8x8xf32> to vector<8xf32>
    %77 = vector.shape_cast %76 : vector<8xf32> to vector<1x8xf32>
    %cst_34 = arith.constant dense<0.000000e+00> : vector<8x8xf32>
    %78 = tpu.matmul %20, %74, %cst_34 {dimension_numbers = #tpu.dot_dimension_numbers<[1], [0], [0], [1], [0, 0, 1, 1], [], []>} : vector<8x8xf32>, vector<8x8xf32>, vector<8x8xf32> -> vector<8x8xf32>
    %cst_35 = arith.constant 5.000000e-02 : f32
    %79 = vector.broadcast %cst_35 : f32 to vector<1x8xf32>
    %80 = arith.mulf %79, %77 : vector<1x8xf32>
    %81 = vector.broadcast %80 : vector<1x8xf32> to vector<8x8xf32>
    %82 = arith.addf %78, %81 : vector<8x8xf32>
    %83 = arith.subf %63, %82 : vector<8x8xf32>
    %cst_36 = arith.constant dense<0xFF800000> : vector<8xf32>
    %84 = vector.multi_reduction <maximumf>, %83, %cst_36 [1] : vector<8x8xf32> to vector<8xf32>
    %85 = vector.shape_cast %84 : vector<8xf32> to vector<8x1xf32>
    %86 = vector.broadcast %85 : vector<8x1xf32> to vector<8x8xf32>
    %87 = arith.subf %83, %86 : vector<8x8xf32>
    %88 = math.exp %87 : vector<8x8xf32>
    %cst_37 = arith.constant dense<0.000000e+00> : vector<8xf32>
    %89 = vector.multi_reduction <add>, %88, %cst_37 [1] : vector<8x8xf32> to vector<8xf32>
    %90 = vector.shape_cast %89 : vector<8xf32> to vector<8x1xf32>
    %91 = tpu.reciprocal %90 {approx = true} : vector<8x1xf32> -> vector<8x1xf32>
    %92 = vector.broadcast %91 : vector<8x1xf32> to vector<8x8xf32>
    %93 = arith.mulf %88, %92 : vector<8x8xf32>
    %94 = arith.subf %93, %6 : vector<8x8xf32>
    %95 = arith.addf %75, %94 : vector<8x8xf32>
    %cst_38 = arith.constant dense<0.000000e+00> : vector<8xf32>
    %96 = vector.multi_reduction <add>, %94, %cst_38 [0] : vector<8x8xf32> to vector<8xf32>
    %97 = vector.shape_cast %96 : vector<8xf32> to vector<1x8xf32>
    %cst_39 = arith.constant dense<0.000000e+00> : vector<8x8xf32>
    %98 = tpu.matmul %20, %94, %cst_39 {dimension_numbers = #tpu.dot_dimension_numbers<[1], [0], [0], [1], [0, 0, 1, 1], [], []>} : vector<8x8xf32>, vector<8x8xf32>, vector<8x8xf32> -> vector<8x8xf32>
    %cst_40 = arith.constant 5.000000e-02 : f32
    %99 = vector.broadcast %cst_40 : f32 to vector<1x8xf32>
    %100 = arith.mulf %99, %97 : vector<1x8xf32>
    %101 = vector.broadcast %100 : vector<1x8xf32> to vector<8x8xf32>
    %102 = arith.addf %98, %101 : vector<8x8xf32>
    %103 = arith.subf %83, %102 : vector<8x8xf32>
    %cst_41 = arith.constant dense<0xFF800000> : vector<8xf32>
    %104 = vector.multi_reduction <maximumf>, %103, %cst_41 [1] : vector<8x8xf32> to vector<8xf32>
    %105 = vector.shape_cast %104 : vector<8xf32> to vector<8x1xf32>
    %106 = vector.broadcast %105 : vector<8x1xf32> to vector<8x8xf32>
    %107 = arith.subf %103, %106 : vector<8x8xf32>
    %108 = math.exp %107 : vector<8x8xf32>
    %cst_42 = arith.constant dense<0.000000e+00> : vector<8xf32>
    %109 = vector.multi_reduction <add>, %108, %cst_42 [1] : vector<8x8xf32> to vector<8xf32>
    %110 = vector.shape_cast %109 : vector<8xf32> to vector<8x1xf32>
    %111 = tpu.reciprocal %110 {approx = true} : vector<8x1xf32> -> vector<8x1xf32>
    %112 = vector.broadcast %111 : vector<8x1xf32> to vector<8x8xf32>
    %113 = arith.mulf %108, %112 : vector<8x8xf32>
    %114 = arith.subf %113, %6 : vector<8x8xf32>
    %115 = arith.addf %95, %114 : vector<8x8xf32>
    %cst_43 = arith.constant dense<0.000000e+00> : vector<8xf32>
    %116 = vector.multi_reduction <add>, %115, %cst_43 [0] : vector<8x8xf32> to vector<8xf32>
    %117 = vector.shape_cast %116 : vector<8xf32> to vector<1x8xf32>
    %cst_44 = arith.constant dense<0.000000e+00> : vector<8x8xf32>
    %118 = tpu.matmul %22, %115, %cst_44 {dimension_numbers = #tpu.dot_dimension_numbers<[1], [0], [0], [1], [0, 0, 1, 1], [], []>} : vector<8x8xf32>, vector<8x8xf32>, vector<8x8xf32> -> vector<8x8xf32>
    %cst_45 = arith.constant 5.000000e-02 : f32
    %119 = vector.broadcast %cst_45 : f32 to vector<1x8xf32>
    %120 = arith.mulf %119, %117 : vector<1x8xf32>
    %121 = vector.broadcast %120 : vector<1x8xf32> to vector<8x8xf32>
    %122 = arith.addf %118, %121 : vector<8x8xf32>
    %123 = arith.subf %16, %122 : vector<8x8xf32>
    %cst_46 = arith.constant dense<0xFF800000> : vector<8xf32>
    %124 = vector.multi_reduction <maximumf>, %123, %cst_46 [1] : vector<8x8xf32> to vector<8xf32>
    %125 = vector.shape_cast %124 : vector<8xf32> to vector<8x1xf32>
    %126 = vector.broadcast %125 : vector<8x1xf32> to vector<8x8xf32>
    %127 = arith.subf %123, %126 : vector<8x8xf32>
    %128 = math.exp %127 : vector<8x8xf32>
    %cst_47 = arith.constant dense<0.000000e+00> : vector<8xf32>
    %129 = vector.multi_reduction <add>, %128, %cst_47 [1] : vector<8x8xf32> to vector<8xf32>
    %130 = vector.shape_cast %129 : vector<8xf32> to vector<8x1xf32>
    %131 = math.log %130 : vector<8x1xf32>
    %132 = arith.addf %125, %131 : vector<8x1xf32>
    %133 = arith.mulf %10, %123 : vector<8x8xf32>
    %cst_48 = arith.constant dense<0.000000e+00> : vector<8xf32>
    %134 = vector.multi_reduction <add>, %133, %cst_48 [1] : vector<8x8xf32> to vector<8xf32>
    %135 = vector.shape_cast %134 : vector<8xf32> to vector<8x1xf32>
    %136 = arith.subf %132, %135 : vector<8x1xf32>
    %137 = vector.shape_cast %136 : vector<8x1xf32> to vector<1x8x1xf32>
    %cst_49 = arith.constant dense<0.000000e+00> : vector<1xf32>
    %138 = vector.multi_reduction <add>, %137, %cst_49 [1, 2] : vector<1x8x1xf32> to vector<1xf32>
    %139 = vector.shape_cast %138 : vector<1xf32> to vector<1x1x1xf32>
    %140 = vector.extract %139[0, 0, 0] : f32 from vector<1x1x1xf32>
    %141 = vector.broadcast %140 : f32 to vector<1x1xf32>
    %cst_50 = arith.constant 8.000000e+00 : f32
    %142 = vector.broadcast %cst_50 : f32 to vector<1x1xf32>
    %143 = arith.divf %141, %142 : vector<1x1xf32>
    %144 = tpu.iota {dimensions = array<i32: 1>} : vector<8x8xi32>
    %145 = vector.broadcast %125 : vector<8x1xf32> to vector<8x8xf32>
    %146 = arith.cmpf oeq, %123, %145 : vector<8x8xf32>
    %c8_i32 = arith.constant 8 : i32
    %147 = vector.broadcast %c8_i32 : i32 to vector<8x8xi32>
    %148 = arith.select %146, %144, %147 : vector<8x8xi1>, vector<8x8xi32>
    %cst_51 = arith.constant dense<2147483647> : vector<8xi32>
    %149 = vector.multi_reduction <minsi>, %148, %cst_51 [1] : vector<8x8xi32> to vector<8xi32>
    %150 = vector.shape_cast %149 : vector<8xi32> to vector<8x1xi32>
    %151 = arith.sitofp %144 : vector<8x8xi32> to vector<8x8xf32>
    %152 = arith.mulf %10, %151 : vector<8x8xf32>
    %cst_52 = arith.constant dense<0.000000e+00> : vector<8xf32>
    %153 = vector.multi_reduction <add>, %152, %cst_52 [1] : vector<8x8xf32> to vector<8xf32>
    %154 = vector.shape_cast %153 : vector<8xf32> to vector<8x1xf32>
    %155 = arith.sitofp %150 : vector<8x1xi32> to vector<8x1xf32>
    %156 = arith.cmpf oeq, %155, %154 : vector<8x1xf32>
    %157 = arith.extui %156 : vector<8x1xi1> to vector<8x1xi32>
    %158 = arith.sitofp %157 : vector<8x1xi32> to vector<8x1xf32>
    %159 = vector.shape_cast %158 : vector<8x1xf32> to vector<1x8x1xf32>
    %cst_53 = arith.constant dense<0.000000e+00> : vector<1xf32>
    %160 = vector.multi_reduction <add>, %159, %cst_53 [1, 2] : vector<1x8x1xf32> to vector<1xf32>
    %161 = vector.shape_cast %160 : vector<1xf32> to vector<1x1x1xf32>
    %162 = vector.extract %161[0, 0, 0] : f32 from vector<1x1x1xf32>
    %163 = vector.broadcast %162 : f32 to vector<1x1xf32>
    %cst_54 = arith.constant 8.000000e+00 : f32
    %164 = vector.broadcast %cst_54 : f32 to vector<1x1xf32>
    %165 = arith.divf %163, %164 : vector<1x1xf32>
    %c0_i32 = arith.constant 0 : i32
    %166 = vector.broadcast %c0_i32 : i32 to vector<1x2xi32>
    %167 = arith.cmpi eq, %2, %166 : vector<1x2xi32>
    %168 = vector.shape_cast %143 : vector<1x1xf32> to vector<1x1xf32>
    %169 = vector.broadcast %168 : vector<1x1xf32> to vector<1x2xf32>
    %170 = vector.shape_cast %165 : vector<1x1xf32> to vector<1x1xf32>
    %171 = vector.broadcast %170 : vector<1x1xf32> to vector<1x2xf32>
    %172 = arith.select %167, %169, %171 : vector<1x2xi1>, vector<1x2xf32>
    %c0_55 = arith.constant 0 : index
    %c0_56 = arith.constant 0 : index
    %c0_57 = arith.constant 0 : index
    %173 = vector.load %arg7[%c0_55, %c0_56, %c0_57] : memref<1x2x2xf32, #tpu.memory_space<vmem>>, vector<1x1x2xf32>
    %174 = vector.shape_cast %173 : vector<1x1x2xf32> to vector<1x2xf32>
    %175 = vector.shape_cast %172 : vector<1x2xf32> to vector<1x1x2xf32>
    tpu.vector_store %arg7[%c0_55, %c0_56, %c0_57], %175 {strides = array<i32>} : memref<1x2x2xf32, #tpu.memory_space<vmem>>, vector<1x1x2xf32>,
    %c1 = arith.constant 1 : index
    %c0_58 = arith.constant 0 : index
    %c0_59 = arith.constant 0 : index
    %176 = vector.load %arg1[%c1, %c0_58, %c0_59] : memref<2x8x1024xbf16, #tpu.memory_space<vmem>>, vector<1x8x1024xbf16>
    %177 = vector.shape_cast %176 : vector<1x8x1024xbf16> to vector<8x1024xbf16>
    %c1_60 = arith.constant 1 : index
    %c0_61 = arith.constant 0 : index
    %c0_62 = arith.constant 0 : index
    %178 = vector.load %arg2[%c1_60, %c0_61, %c0_62] : memref<2x8x8xf32, #tpu.memory_space<vmem>>, vector<1x8x8xf32>
    %179 = vector.shape_cast %178 : vector<1x8x8xf32> to vector<8x8xf32>
    %c1_63 = arith.constant 1 : index
    %c0_64 = arith.constant 0 : index
    %c0_65 = arith.constant 0 : index
    %180 = vector.load %arg3[%c1_63, %c0_64, %c0_65] : memref<2x8x1024xbf16, #tpu.memory_space<vmem>>, vector<1x8x1024xbf16>
    %181 = vector.shape_cast %180 : vector<1x8x1024xbf16> to vector<8x1024xbf16>
    %c1_66 = arith.constant 1 : index
    %c0_67 = arith.constant 0 : index
    %c0_68 = arith.constant 0 : index
    %182 = vector.load %arg4[%c1_66, %c0_67, %c0_68] : memref<2x8x8xf32, #tpu.memory_space<vmem>>, vector<1x8x8xf32>
    %183 = vector.shape_cast %182 : vector<1x8x8xf32> to vector<8x8xf32>
    %cst_69 = arith.constant dense<0.000000e+00> : vector<8x8xf32>
    %184 = tpu.matmul %177, %0, %cst_69 {dimension_numbers = #tpu.dot_dimension_numbers<[1], [1], [0], [0], [0, 0, 1, 0], [], []>} : vector<8x1024xbf16>, vector<8x1024xbf16>, vector<8x8xf32> -> vector<8x8xf32>
    %185 = vector.broadcast %1 : vector<1x8xf32> to vector<8x8xf32>
    %186 = arith.addf %184, %185 : vector<8x8xf32>
    %cst_70 = arith.constant dense<0.000000e+00> : vector<8x8xf32>
    %187 = tpu.matmul %181, %0, %cst_70 {dimension_numbers = #tpu.dot_dimension_numbers<[1], [1], [0], [0], [0, 0, 1, 0], [], []>} : vector<8x1024xbf16>, vector<8x1024xbf16>, vector<8x8xf32> -> vector<8x8xf32>
    %188 = vector.broadcast %1 : vector<1x8xf32> to vector<8x8xf32>
    %189 = arith.addf %187, %188 : vector<8x8xf32>
    %cst_71 = arith.constant dense<0.000000e+00> : vector<8x8xf32>
    %190 = tpu.matmul %177, %177, %cst_71 {dimension_numbers = #tpu.dot_dimension_numbers<[1], [1], [0], [0], [0, 0, 1, 0], [], []>} : vector<8x1024xbf16>, vector<8x1024xbf16>, vector<8x8xf32> -> vector<8x8xf32>
    %cst_72 = arith.constant dense<0.000000e+00> : vector<8x8xf32>
    %191 = tpu.matmul %181, %177, %cst_72 {dimension_numbers = #tpu.dot_dimension_numbers<[1], [1], [0], [0], [0, 0, 1, 0], [], []>} : vector<8x1024xbf16>, vector<8x1024xbf16>, vector<8x8xf32> -> vector<8x8xf32>
    %cst_73 = arith.constant 5.000000e-02 : f32
    %192 = vector.broadcast %cst_73 : f32 to vector<8x8xf32>
    %193 = arith.mulf %190, %192 : vector<8x8xf32>
    %cst_74 = arith.constant 5.000000e-02 : f32
    %194 = vector.broadcast %cst_74 : f32 to vector<8x8xf32>
    %195 = arith.mulf %191, %194 : vector<8x8xf32>
    %cst_75 = arith.constant 0.000000e+00 : f32
    %196 = vector.broadcast %cst_75 : f32 to vector<8x8xf32>
    %cst_76 = arith.constant dense<0xFF800000> : vector<8xf32>
    %197 = vector.multi_reduction <maximumf>, %186, %cst_76 [1] : vector<8x8xf32> to vector<8xf32>
    %198 = vector.shape_cast %197 : vector<8xf32> to vector<8x1xf32>
    %199 = vector.broadcast %198 : vector<8x1xf32> to vector<8x8xf32>
    %200 = arith.subf %186, %199 : vector<8x8xf32>
    %201 = math.exp %200 : vector<8x8xf32>
    %cst_77 = arith.constant dense<0.000000e+00> : vector<8xf32>
    %202 = vector.multi_reduction <add>, %201, %cst_77 [1] : vector<8x8xf32> to vector<8xf32>
    %203 = vector.shape_cast %202 : vector<8xf32> to vector<8x1xf32>
    %204 = tpu.reciprocal %203 {approx = true} : vector<8x1xf32> -> vector<8x1xf32>
    %205 = vector.broadcast %204 : vector<8x1xf32> to vector<8x8xf32>
    %206 = arith.mulf %201, %205 : vector<8x8xf32>
    %207 = arith.subf %206, %179 : vector<8x8xf32>
    %208 = arith.addf %196, %207 : vector<8x8xf32>
    %cst_78 = arith.constant dense<0.000000e+00> : vector<8xf32>
    %209 = vector.multi_reduction <add>, %207, %cst_78 [0] : vector<8x8xf32> to vector<8xf32>
    %210 = vector.shape_cast %209 : vector<8xf32> to vector<1x8xf32>
    %cst_79 = arith.constant dense<0.000000e+00> : vector<8x8xf32>
    %211 = tpu.matmul %193, %207, %cst_79 {dimension_numbers = #tpu.dot_dimension_numbers<[1], [0], [0], [1], [0, 0, 1, 1], [], []>} : vector<8x8xf32>, vector<8x8xf32>, vector<8x8xf32> -> vector<8x8xf32>
    %cst_80 = arith.constant 5.000000e-02 : f32
    %212 = vector.broadcast %cst_80 : f32 to vector<1x8xf32>
    %213 = arith.mulf %212, %210 : vector<1x8xf32>
    %214 = vector.broadcast %213 : vector<1x8xf32> to vector<8x8xf32>
    %215 = arith.addf %211, %214 : vector<8x8xf32>
    %216 = arith.subf %186, %215 : vector<8x8xf32>
    %cst_81 = arith.constant dense<0xFF800000> : vector<8xf32>
    %217 = vector.multi_reduction <maximumf>, %216, %cst_81 [1] : vector<8x8xf32> to vector<8xf32>
    %218 = vector.shape_cast %217 : vector<8xf32> to vector<8x1xf32>
    %219 = vector.broadcast %218 : vector<8x1xf32> to vector<8x8xf32>
    %220 = arith.subf %216, %219 : vector<8x8xf32>
    %221 = math.exp %220 : vector<8x8xf32>
    %cst_82 = arith.constant dense<0.000000e+00> : vector<8xf32>
    %222 = vector.multi_reduction <add>, %221, %cst_82 [1] : vector<8x8xf32> to vector<8xf32>
    %223 = vector.shape_cast %222 : vector<8xf32> to vector<8x1xf32>
    %224 = tpu.reciprocal %223 {approx = true} : vector<8x1xf32> -> vector<8x1xf32>
    %225 = vector.broadcast %224 : vector<8x1xf32> to vector<8x8xf32>
    %226 = arith.mulf %221, %225 : vector<8x8xf32>
    %227 = arith.subf %226, %179 : vector<8x8xf32>
    %228 = arith.addf %208, %227 : vector<8x8xf32>
    %cst_83 = arith.constant dense<0.000000e+00> : vector<8xf32>
    %229 = vector.multi_reduction <add>, %227, %cst_83 [0] : vector<8x8xf32> to vector<8xf32>
    %230 = vector.shape_cast %229 : vector<8xf32> to vector<1x8xf32>
    %cst_84 = arith.constant dense<0.000000e+00> : vector<8x8xf32>
    %231 = tpu.matmul %193, %227, %cst_84 {dimension_numbers = #tpu.dot_dimension_numbers<[1], [0], [0], [1], [0, 0, 1, 1], [], []>} : vector<8x8xf32>, vector<8x8xf32>, vector<8x8xf32> -> vector<8x8xf32>
    %cst_85 = arith.constant 5.000000e-02 : f32
    %232 = vector.broadcast %cst_85 : f32 to vector<1x8xf32>
    %233 = arith.mulf %232, %230 : vector<1x8xf32>
    %234 = vector.broadcast %233 : vector<1x8xf32> to vector<8x8xf32>
    %235 = arith.addf %231, %234 : vector<8x8xf32>
    %236 = arith.subf %216, %235 : vector<8x8xf32>
    %cst_86 = arith.constant dense<0xFF800000> : vector<8xf32>
    %237 = vector.multi_reduction <maximumf>, %236, %cst_86 [1] : vector<8x8xf32> to vector<8xf32>
    %238 = vector.shape_cast %237 : vector<8xf32> to vector<8x1xf32>
    %239 = vector.broadcast %238 : vector<8x1xf32> to vector<8x8xf32>
    %240 = arith.subf %236, %239 : vector<8x8xf32>
    %241 = math.exp %240 : vector<8x8xf32>
    %cst_87 = arith.constant dense<0.000000e+00> : vector<8xf32>
    %242 = vector.multi_reduction <add>, %241, %cst_87 [1] : vector<8x8xf32> to vector<8xf32>
    %243 = vector.shape_cast %242 : vector<8xf32> to vector<8x1xf32>
    %244 = tpu.reciprocal %243 {approx = true} : vector<8x1xf32> -> vector<8x1xf32>
    %245 = vector.broadcast %244 : vector<8x1xf32> to vector<8x8xf32>
    %246 = arith.mulf %241, %245 : vector<8x8xf32>
    %247 = arith.subf %246, %179 : vector<8x8xf32>
    %248 = arith.addf %228, %247 : vector<8x8xf32>
    %cst_88 = arith.constant dense<0.000000e+00> : vector<8xf32>
    %249 = vector.multi_reduction <add>, %247, %cst_88 [0] : vector<8x8xf32> to vector<8xf32>
    %250 = vector.shape_cast %249 : vector<8xf32> to vector<1x8xf32>
    %cst_89 = arith.constant dense<0.000000e+00> : vector<8x8xf32>
    %251 = tpu.matmul %193, %247, %cst_89 {dimension_numbers = #tpu.dot_dimension_numbers<[1], [0], [0], [1], [0, 0, 1, 1], [], []>} : vector<8x8xf32>, vector<8x8xf32>, vector<8x8xf32> -> vector<8x8xf32>
    %cst_90 = arith.constant 5.000000e-02 : f32
    %252 = vector.broadcast %cst_90 : f32 to vector<1x8xf32>
    %253 = arith.mulf %252, %250 : vector<1x8xf32>
    %254 = vector.broadcast %253 : vector<1x8xf32> to vector<8x8xf32>
    %255 = arith.addf %251, %254 : vector<8x8xf32>
    %256 = arith.subf %236, %255 : vector<8x8xf32>
    %cst_91 = arith.constant dense<0xFF800000> : vector<8xf32>
    %257 = vector.multi_reduction <maximumf>, %256, %cst_91 [1] : vector<8x8xf32> to vector<8xf32>
    %258 = vector.shape_cast %257 : vector<8xf32> to vector<8x1xf32>
    %259 = vector.broadcast %258 : vector<8x1xf32> to vector<8x8xf32>
    %260 = arith.subf %256, %259 : vector<8x8xf32>
    %261 = math.exp %260 : vector<8x8xf32>
    %cst_92 = arith.constant dense<0.000000e+00> : vector<8xf32>
    %262 = vector.multi_reduction <add>, %261, %cst_92 [1] : vector<8x8xf32> to vector<8xf32>
    %263 = vector.shape_cast %262 : vector<8xf32> to vector<8x1xf32>
    %264 = tpu.reciprocal %263 {approx = true} : vector<8x1xf32> -> vector<8x1xf32>
    %265 = vector.broadcast %264 : vector<8x1xf32> to vector<8x8xf32>
    %266 = arith.mulf %261, %265 : vector<8x8xf32>
    %267 = arith.subf %266, %179 : vector<8x8xf32>
    %268 = arith.addf %248, %267 : vector<8x8xf32>
    %cst_93 = arith.constant dense<0.000000e+00> : vector<8xf32>
    %269 = vector.multi_reduction <add>, %267, %cst_93 [0] : vector<8x8xf32> to vector<8xf32>
    %270 = vector.shape_cast %269 : vector<8xf32> to vector<1x8xf32>
    %cst_94 = arith.constant dense<0.000000e+00> : vector<8x8xf32>
    %271 = tpu.matmul %193, %267, %cst_94 {dimension_numbers = #tpu.dot_dimension_numbers<[1], [0], [0], [1], [0, 0, 1, 1], [], []>} : vector<8x8xf32>, vector<8x8xf32>, vector<8x8xf32> -> vector<8x8xf32>
    %cst_95 = arith.constant 5.000000e-02 : f32
    %272 = vector.broadcast %cst_95 : f32 to vector<1x8xf32>
    %273 = arith.mulf %272, %270 : vector<1x8xf32>
    %274 = vector.broadcast %273 : vector<1x8xf32> to vector<8x8xf32>
    %275 = arith.addf %271, %274 : vector<8x8xf32>
    %276 = arith.subf %256, %275 : vector<8x8xf32>
    %cst_96 = arith.constant dense<0xFF800000> : vector<8xf32>
    %277 = vector.multi_reduction <maximumf>, %276, %cst_96 [1] : vector<8x8xf32> to vector<8xf32>
    %278 = vector.shape_cast %277 : vector<8xf32> to vector<8x1xf32>
    %279 = vector.broadcast %278 : vector<8x1xf32> to vector<8x8xf32>
    %280 = arith.subf %276, %279 : vector<8x8xf32>
    %281 = math.exp %280 : vector<8x8xf32>
    %cst_97 = arith.constant dense<0.000000e+00> : vector<8xf32>
    %282 = vector.multi_reduction <add>, %281, %cst_97 [1] : vector<8x8xf32> to vector<8xf32>
    %283 = vector.shape_cast %282 : vector<8xf32> to vector<8x1xf32>
    %284 = tpu.reciprocal %283 {approx = true} : vector<8x1xf32> -> vector<8x1xf32>
    %285 = vector.broadcast %284 : vector<8x1xf32> to vector<8x8xf32>
    %286 = arith.mulf %281, %285 : vector<8x8xf32>
    %287 = arith.subf %286, %179 : vector<8x8xf32>
    %288 = arith.addf %268, %287 : vector<8x8xf32>
    %cst_98 = arith.constant dense<0.000000e+00> : vector<8xf32>
    %289 = vector.multi_reduction <add>, %288, %cst_98 [0] : vector<8x8xf32> to vector<8xf32>
    %290 = vector.shape_cast %289 : vector<8xf32> to vector<1x8xf32>
    %cst_99 = arith.constant dense<0.000000e+00> : vector<8x8xf32>
    %291 = tpu.matmul %195, %288, %cst_99 {dimension_numbers = #tpu.dot_dimension_numbers<[1], [0], [0], [1], [0, 0, 1, 1], [], []>} : vector<8x8xf32>, vector<8x8xf32>, vector<8x8xf32> -> vector<8x8xf32>
    %cst_100 = arith.constant 5.000000e-02 : f32
    %292 = vector.broadcast %cst_100 : f32 to vector<1x8xf32>
    %293 = arith.mulf %292, %290 : vector<1x8xf32>
    %294 = vector.broadcast %293 : vector<1x8xf32> to vector<8x8xf32>
    %295 = arith.addf %291, %294 : vector<8x8xf32>
    %296 = arith.subf %189, %295 : vector<8x8xf32>
    %cst_101 = arith.constant dense<0xFF800000> : vector<8xf32>
    %297 = vector.multi_reduction <maximumf>, %296, %cst_101 [1] : vector<8x8xf32> to vector<8xf32>
    %298 = vector.shape_cast %297 : vector<8xf32> to vector<8x1xf32>
    %299 = vector.broadcast %298 : vector<8x1xf32> to vector<8x8xf32>
    %300 = arith.subf %296, %299 : vector<8x8xf32>
    %301 = math.exp %300 : vector<8x8xf32>
    %cst_102 = arith.constant dense<0.000000e+00> : vector<8xf32>
    %302 = vector.multi_reduction <add>, %301, %cst_102 [1] : vector<8x8xf32> to vector<8xf32>
    %303 = vector.shape_cast %302 : vector<8xf32> to vector<8x1xf32>
    %304 = math.log %303 : vector<8x1xf32>
    %305 = arith.addf %298, %304 : vector<8x1xf32>
    %306 = arith.mulf %183, %296 : vector<8x8xf32>
    %cst_103 = arith.constant dense<0.000000e+00> : vector<8xf32>
    %307 = vector.multi_reduction <add>, %306, %cst_103 [1] : vector<8x8xf32> to vector<8xf32>
    %308 = vector.shape_cast %307 : vector<8xf32> to vector<8x1xf32>
    %309 = arith.subf %305, %308 : vector<8x1xf32>
    %310 = vector.shape_cast %309 : vector<8x1xf32> to vector<1x8x1xf32>
    %cst_104 = arith.constant dense<0.000000e+00> : vector<1xf32>
    %311 = vector.multi_reduction <add>, %310, %cst_104 [1, 2] : vector<1x8x1xf32> to vector<1xf32>
    %312 = vector.shape_cast %311 : vector<1xf32> to vector<1x1x1xf32>
    %313 = vector.extract %312[0, 0, 0] : f32 from vector<1x1x1xf32>
    %314 = vector.broadcast %313 : f32 to vector<1x1xf32>
    %cst_105 = arith.constant 8.000000e+00 : f32
    %315 = vector.broadcast %cst_105 : f32 to vector<1x1xf32>
    %316 = arith.divf %314, %315 : vector<1x1xf32>
    %317 = tpu.iota {dimensions = array<i32: 1>} : vector<8x8xi32>
    %318 = vector.broadcast %298 : vector<8x1xf32> to vector<8x8xf32>
    %319 = arith.cmpf oeq, %296, %318 : vector<8x8xf32>
    %c8_i32_106 = arith.constant 8 : i32
    %320 = vector.broadcast %c8_i32_106 : i32 to vector<8x8xi32>
    %321 = arith.select %319, %317, %320 : vector<8x8xi1>, vector<8x8xi32>
    %cst_107 = arith.constant dense<2147483647> : vector<8xi32>
    %322 = vector.multi_reduction <minsi>, %321, %cst_107 [1] : vector<8x8xi32> to vector<8xi32>
    %323 = vector.shape_cast %322 : vector<8xi32> to vector<8x1xi32>
    %324 = arith.sitofp %317 : vector<8x8xi32> to vector<8x8xf32>
    %325 = arith.mulf %183, %324 : vector<8x8xf32>
    %cst_108 = arith.constant dense<0.000000e+00> : vector<8xf32>
    %326 = vector.multi_reduction <add>, %325, %cst_108 [1] : vector<8x8xf32> to vector<8xf32>
    %327 = vector.shape_cast %326 : vector<8xf32> to vector<8x1xf32>
    %328 = arith.sitofp %323 : vector<8x1xi32> to vector<8x1xf32>
    %329 = arith.cmpf oeq, %328, %327 : vector<8x1xf32>
    %330 = arith.extui %329 : vector<8x1xi1> to vector<8x1xi32>
    %331 = arith.sitofp %330 : vector<8x1xi32> to vector<8x1xf32>
    %332 = vector.shape_cast %331 : vector<8x1xf32> to vector<1x8x1xf32>
    %cst_109 = arith.constant dense<0.000000e+00> : vector<1xf32>
    %333 = vector.multi_reduction <add>, %332, %cst_109 [1, 2] : vector<1x8x1xf32> to vector<1xf32>
    %334 = vector.shape_cast %333 : vector<1xf32> to vector<1x1x1xf32>
    %335 = vector.extract %334[0, 0, 0] : f32 from vector<1x1x1xf32>
    %336 = vector.broadcast %335 : f32 to vector<1x1xf32>
    %cst_110 = arith.constant 8.000000e+00 : f32
    %337 = vector.broadcast %cst_110 : f32 to vector<1x1xf32>
    %338 = arith.divf %336, %337 : vector<1x1xf32>
    %c0_i32_111 = arith.constant 0 : i32
    %339 = vector.broadcast %c0_i32_111 : i32 to vector<1x2xi32>
    %340 = arith.cmpi eq, %2, %339 : vector<1x2xi32>
    %341 = vector.shape_cast %316 : vector<1x1xf32> to vector<1x1xf32>
    %342 = vector.broadcast %341 : vector<1x1xf32> to vector<1x2xf32>
    %343 = vector.shape_cast %338 : vector<1x1xf32> to vector<1x1xf32>
    %344 = vector.broadcast %343 : vector<1x1xf32> to vector<1x2xf32>
    %345 = arith.select %340, %342, %344 : vector<1x2xi1>, vector<1x2xf32>
    %c0_112 = arith.constant 0 : index
    %c1_113 = arith.constant 1 : index
    %c0_114 = arith.constant 0 : index
    %346 = vector.load %arg7[%c0_112, %c1_113, %c0_114] : memref<1x2x2xf32, #tpu.memory_space<vmem>>, vector<1x1x2xf32>
    %347 = vector.shape_cast %346 : vector<1x1x2xf32> to vector<1x2xf32>
    %348 = vector.shape_cast %345 : vector<1x2xf32> to vector<1x1x2xf32>
    tpu.vector_store %arg7[%c0_112, %c1_113, %c0_114], %348 {strides = array<i32>} : memref<1x2x2xf32, #tpu.memory_space<vmem>>, vector<1x1x2xf32>,
    return
  }
  func.func @transform_0(%arg0: i32) -> (i32, i32, i32) {
    %c0_i32 = arith.constant 0 : i32
    %c0_i32_0 = arith.constant 0 : i32
    %c0_i32_1 = arith.constant 0 : i32
    return %arg0, %c0_i32, %c0_i32_0 : i32, i32, i32
  }
  func.func @transform_1(%arg0: i32) -> (i32, i32, i32) {
    %c0_i32 = arith.constant 0 : i32
    %c0_i32_0 = arith.constant 0 : i32
    %c0_i32_1 = arith.constant 0 : i32
    return %arg0, %c0_i32, %c0_i32_0 : i32, i32, i32
  }
  func.func @transform_2(%arg0: i32) -> (i32, i32, i32) {
    %c0_i32 = arith.constant 0 : i32
    %c0_i32_0 = arith.constant 0 : i32
    %c0_i32_1 = arith.constant 0 : i32
    return %arg0, %c0_i32, %c0_i32_0 : i32, i32, i32
  }
  func.func @transform_3(%arg0: i32) -> (i32, i32, i32) {
    %c0_i32 = arith.constant 0 : i32
    %c0_i32_0 = arith.constant 0 : i32
    %c0_i32_1 = arith.constant 0 : i32
    return %arg0, %c0_i32, %c0_i32_0 : i32, i32, i32
  }
  func.func @transform_4(%arg0: i32) -> (i32, i32) {
    %c0_i32 = arith.constant 0 : i32
    %c0_i32_0 = arith.constant 0 : i32
    %c0_i32_1 = arith.constant 0 : i32
    return %c0_i32, %c0_i32_0 : i32, i32
  }
  func.func @transform_5(%arg0: i32) -> (i32, i32) {
    %c0_i32 = arith.constant 0 : i32
    %c0_i32_0 = arith.constant 0 : i32
    %c0_i32_1 = arith.constant 0 : i32
    return %c0_i32, %c0_i32_0 : i32, i32
  }
  func.func @transform_6(%arg0: i32) -> (i32, i32, i32) {
    %c0_i32 = arith.constant 0 : i32
    %c0_i32_0 = arith.constant 0 : i32
    %c0_i32_1 = arith.constant 0 : i32
    return %arg0, %c0_i32, %c0_i32_0 : i32, i32, i32
  }
}

</mosaic_0001>

<bundles_post_ra>
// kernel: tpu_custom_call.1
= control target key start
LH: loop header
LB: loop body
LE: loop exit
PB: predicated region body
PF: predicated region fallthrough
CT: control target
= control target key end

     0   :  { %s4519_s0 = inlined_call_operand.hbm [shape: bf16[4,8,1024], index: 0, kind: input, shape index: {}]   ;;  %s4520_s1 = inlined_call_operand.hbm [shape: f32[4,8,8], index: 1, kind: input, shape index: {}]   ;;  %s4521_s2 = inlined_call_operand.hbm [shape: bf16[4,8,1024], index: 2, kind: input, shape index: {}]   ;;  %s4522_s3 = inlined_call_operand.hbm [shape: f32[4,8,8], index: 3, kind: input, shape index: {}]   ;;  %s4523_s4 = inlined_call_operand.hbm [shape: bf16[8,1024], index: 4, kind: input, shape index: {}]   ;;  %s4524_s5 = inlined_call_operand.vmem [shape: f32[1,8], index: 5, kind: input, shape index: {}]   ;;  %s4525_s6 = inlined_call_operand.hbm [shape: f32[2,2,2], index: 6, kind: output, shape index: {}]  }
   0x1   :  { %4540 = sst [smem:[#allocation22_spill]] %s4520_s1 }
   0x2   :  { %4541 = sst [smem:[#allocation23_spill]] %s4523_s4 }
   0x3   :  { %11 = vsyncpa [#allocation3], 0 }
   0x4   :  { %13 = vsyncpa [#allocation3 + $0x1], 0 }
   0x5   :  { %14 = vsyncpa [#allocation6], 0 }
   0x6   :  { %16 = vsyncpa [#allocation6 + $0x1], 0 }
   0x7   :  { %17 = vsyncpa [#allocation9], 0 }
   0x8   :  { %19 = vsyncpa [#allocation9 + $0x1], 0 }
   0x9   :  { %20 = vsyncpa [#allocation4], 0 }
   0xa   :  { %22 = vsyncpa [#allocation4 + $0x1], 0  ;;  %s3818_s21 = smov 0   ;;  %s3820_s22 = smov 0  }
   0xb   :  { %s3822_s23 = smov 0   ;;  %s3824_s24 = smov 0  }
   0xc LB: > { %4542 = sst [smem:[#allocation17_spill]] %s3757_s21  ;;  %s3839_s25 = sadd.s32 4294967295, %s3769_s24   ;;  %s3769_s24 = sphi %s3824_s24, %s4572_s24   ;;  %s3765_s23 = sphi %s3822_s23, %s4574_s23   ;;  %s3761_s22 = sphi %s3820_s22, %s4576_s22   ;;  %s3757_s21 = sphi %s3818_s21, %s4575_s21  }
   0xd   : > { %4543 = sst [smem:[#allocation18_spill]] %s3765_s23  ;;  %s3100_s26 = sadd.s32 4294967294, %s3769_s24  }
   0xe   : > { %s3843_s27 = sadd.s32 1, %s3769_s24   ;;  %s35_s28 = sadd.s32 1, %s3765_s23 }
   0xf   : > { %4544 = sst [smem:[#allocation19_spill]] %s3843_s27  ;;  %s32_s29 = ssub.s32 %s3769_s24, %s3843_s27 }
  0x10   : > { %p42_p0 = scmp.ne.s32.totalorder %s3765_s23, %s3761_s22  ;;  %p33_p1 = scmp.eq.s32.totalorder %s32_s29, 0 }
  0x11   : > { %p43_p2 = scmp.eq.s32.totalorder %s3769_s24, 0  ;;  %p48_p3 = scmp.ne.s32.totalorder %s3761_s22, %s3757_s21 }
  0x12   : > { %p4526_p4 = scmp.eq.s32.totalorder %s3839_s25, 0  ;;  %p192_p7 = scmp.eq.s32.totalorder %s3839_s25, 1 }
  0x13   : > { %s3855_s30 = scalar_select %p33_p1, %s3765_s23, %s35_s28  }
  0x14   : > { %p3857_p5 = por %p43_p2, %p42_p0  ;;  %p3863_p6 = por %p4526_p4, %p48_p3 }
  0x15   : > { %4545 = sst [smem:[#allocation20_spill]] %s3855_s30  ;;  %p198_p8 = scmp.eq.s32.totalorder %s3100_s26, 1 }
  0x16   : > { %s4547_s8 = scalar_select %p3863_p6, 1, 0 }
  0x17   : > { %p3101_p9 = scmp.ge.s32.totalorder %s3769_s24, 1  ;;  %p205_p10 = scmp.lt.s32.totalorder %s3769_s24, 3 }
  0x18   : > { %p3870_p11 = por %p192_p7, %p42_p0  ;;  %p3874_p12 = por %p198_p8, %p48_p3 }
  0x19   : > { %p3878_p13 = pnand %p3101_p9, %p205_p10  ;;  %s3771_s12 = smov [#allocation10]  }
  0x1a   : > { %s4548_s9 = scalar_select %p3870_p11, 1, 0 }
  0x1b   : > { %s4549_s10 = scalar_select %p3874_p12, 1, 0 }
  0x1c   : > { %s4551_s11 = scalar_select %p3878_p13, 1, 0 }
  0x1d   : > { %4550 = sst [smem:[#allocation21_spill]] %s4549_s10  ;;  %p3390_p2 = pneg %p3878_p13 }
  0x1e   : > { %s218_s13 = sshll.u32 %s3771_s12, 4  ;;  %p3412_p4 = scmp.lt.s32.totalorder %s3769_s24, 2  ;;  %s219_s13 = int_to_ptr.vmem [resolvable:$true] %s218_s13 }
  0x1f   : > { %p4552_p0 = scmp.eq.s32.totalorder %s3839_s25, 0  ;;  %s3893_s15 = sand.u32 1, %s3765_s23  }
  0x20   : > { %p3897_p3 = pnand %p3412_p4, %p3857_p5  ;;  %s4533_s17 = sand.u32 1, %s3769_s24  }
  0x21   : > { %p3888_p7 = pnand %p3390_p2, %p4552_p0  ;;  %s4555_s4 = sld [smem:[#allocation23_spill]] }
  0x22   : > { %s4554_s16 = scalar_select %p3897_p3, 1, 0 }
  0x23   : > { %p3545_p9 = pneg %p3888_p7 }
  0x27   : > { %s3543_s20 = scalar_lea.hbm %s4555_s4, 512 }
  0x28   : > { %p3544_p8 = scmp.ne.s32.totalorder %s4555_s4, %s3543_s20  ;;  %p3550_p4 = scmp.lt.u32.totalorder %s3543_s20, %s4555_s4 }
  0x2a   : > { %p3546_p10 = pnand %p3545_p9, %p3544_p8 }
  0x2c   : > { %p3547_p2 = pneg %p3546_p10 }
  0x2e   : > { %p3552_p5 = pnand %p3550_p4, %p3547_p2 }
  0x30   : > { %3555 = shalt.err (!%p3552_p5)
}
  0x31   : > { %s3556_s7 = scalar_lea.vmem %s219_s13, 512  ;;  %p3564_p11 = scmp.lt.s32.totalorder %s219_s13, %s219_s13 }
  0x32   : > { %p3557_p0 = scmp.ne.s32.totalorder %s219_s13, %s3556_s7  ;;  %p3565_p6 = scmp.lt.s32.totalorder %s3556_s7, %s3556_s7 }
  0x34   : > { %p3559_p1 = pnand %p3557_p0, %p3545_p9  ;;  %p3566_p13 = por %p3565_p6, %p3564_p11 }
  0x36   : > { %p3560_p12 = pneg %p3559_p1 }
  0x38   : > { %p3567_p3 = pnand %p3566_p13, %p3560_p12 }
  0x3a   : > { %3570 = shalt.err (!%p3567_p3)
}
  0x3b   : > { %3393 = dma.hbm_to_vmem [thread:$0]  (!%p3888_p7), %s4555_s4, 512, %s219_s13, [#allocation9]  }
  0x3c   : > { %s4531_s20 = sshll.u32 %s3893_s15, 4  ;;  %s4532_s26 = sshll.u32 %s3769_s24, 8 }
  0x3d   : > { %s4556_s1 = sld [smem:[#allocation22_spill]]  ;;  %s258_s14 = scalar_lea.vmem [#allocation5], %s4531_s20 }
  0x3e   : > { %s265_s7 = sshll.u32 %s258_s14, 4  ;;  %s3933_s18 = scalar_lea.sflag [#allocation6], %s4533_s17  ;;  %s3929_s7 = int_to_ptr.vmem [resolvable:$true] %s265_s7 }
  0x3f   : > { %p4557_p11 = scmp.ne.s32.totalorder %s4554_s16, 0 }
  0x41   : > { %p3939_p12 = pneg %p4557_p11 }
  0x43   : > { %s3925_s12 = scalar_lea.hbm %s4556_s1, %s4532_s26  ;;  %s3576_s14 = scalar_lea.hbm %s4556_s1, 512 }
  0x44   : > { %s3571_s13 = scalar_lea.hbm %s3925_s12, 256  ;;  %p3577_p7 = scmp.lt.u32.totalorder %s3925_s12, %s4556_s1 }
  0x45   : > { %p3572_p6 = scmp.ne.s32.totalorder %s3925_s12, %s3571_s13  ;;  %p3578_p3 = scmp.lt.u32.totalorder %s3576_s14, %s3571_s13 }
  0x46   : > { %p3580_p9 = scmp.lt.u32.totalorder %s3571_s13, %s3925_s12 }
  0x47   : > { %p3574_p13 = pnand %p3939_p12, %p3572_p6  ;;  %p3579_p8 = por %p3578_p3, %p3577_p7 }
  0x49   : > { %p3575_p1 = pneg %p3574_p13  ;;  %p3581_p10 = por %p3580_p9, %p3579_p8 }
  0x4b   : > { %p3582_p2 = pnand %p3581_p10, %p3575_p1 }
  0x4d   : > { %3585 = shalt.err (!%p3582_p2)
}
  0x4e   : > { %s3586_s17 = scalar_lea.vmem %s3929_s7, 256  ;;  %s3772_s28 = smov [#allocation5]  }
  0x4f   : > { %p3587_p4 = scmp.ne.s32.totalorder %s3929_s7, %s3586_s17  ;;  %s3591_s29 = sshll.u32 %s3772_s28, 4  ;;  %s3592_s29 = int_to_ptr.vmem [resolvable:$false] %s3591_s29 }
  0x50   : > { %s3593_s20 = scalar_lea.vmem %s3592_s29, 512  ;;  %p3594_p6 = scmp.lt.s32.totalorder %s3929_s7, %s3592_s29 }
  0x51   : > { %p3589_p5 = pnand %p3587_p4, %p3939_p12  ;;  %p3595_p13 = scmp.lt.s32.totalorder %s3593_s20, %s3586_s17 }
  0x53   : > { %p3590_p0 = pneg %p3589_p5  ;;  %p3596_p7 = por %p3595_p13, %p3594_p6 }
  0x55   : > { %p3597_p3 = pnand %p3596_p7, %p3590_p0 }
  0x57   : > { %3600 = shalt.err (!%p3597_p3)
}
  0x58   : > { %s4539_s26 = smov 128   ;;  %s3774_s13 = smov 8  }
  0x59   : > { %3400 = dma.hbm_to_vmem [thread:$0]  (!%p4557_p11), %s3925_s12, 256, %s3929_s7, %s3933_s18, %s4539_s26, %s4539_s26, %s3774_s13  }
  0x5a   : > { %s4559_s17 = sshll.u32 %s3769_s24, 8  ;;  %s4560_s20 = sshll.u32 %s3893_s15, 4 }
  0x5b   : > { %s3971_s29 = scalar_lea.hbm %s4522_s3, %s4559_s17  ;;  %s301_s1 = scalar_lea.vmem [#allocation8], %s4560_s20 }
  0x5c   : > { %s308_s4 = sshll.u32 %s301_s1, 4  ;;  %s3104_s30 = sshll.u32 %s3893_s15, 6  ;;  %s3975_s4 = int_to_ptr.vmem [resolvable:$true] %s308_s4 }
  0x5d   : > { %s3193_s23 = sshll.u32 %s3769_s24, 10  ;;  %s236_s12 = scalar_lea.vmem [#allocation2], %s3104_s30 }
  0x5e   : > { %s3984_s21 = scalar_lea.hbm %s4519_s0, %s3193_s23  ;;  %s244_s7 = sshll.u32 %s236_s12, 4  ;;  %s3988_s7 = int_to_ptr.vmem [resolvable:$true] %s244_s7 }
  0x5f   : > { %s233_s1 = scalar_lea.sflag [#allocation3], %s3893_s15  ;;  %s3601_s17 = scalar_lea.hbm %s3984_s21, 1024 }
  0x60   : > { %p3602_p1 = scmp.ne.s32.totalorder %s3984_s21, %s3601_s17  ;;  %s3606_s27 = scalar_lea.hbm %s4519_s0, 2048 }
  0x61   : > { %p3607_p10 = scmp.lt.u32.totalorder %s3984_s21, %s4519_s0  ;;  %p3608_p2 = scmp.lt.u32.totalorder %s3606_s27, %s3601_s17 }
  0x62   : > { %p3604_p8 = pnand %p3602_p1, %p3939_p12  ;;  %p3610_p5 = scmp.lt.u32.totalorder %s3601_s17, %s3984_s21 }
  0x63   : > { %p3609_p4 = por %p3608_p2, %p3607_p10 }
  0x64   : > { %p3605_p9 = pneg %p3604_p8 }
  0x65   : > { %p3611_p0 = por %p3610_p5, %p3609_p4 }
  0x67   : > { %p3612_p6 = pnand %p3611_p0, %p3605_p9 }
  0x69   : > { %3615 = shalt.err (!%p3612_p6)
}
  0x6a   : > { %s3616_s12 = scalar_lea.vmem %s3988_s7, 1024  ;;  %s3775_s14 = smov [#allocation2]  }
  0x6b   : > { %p3617_p13 = scmp.ne.s32.totalorder %s3988_s7, %s3616_s12  ;;  %s3621_s28 = sshll.u32 %s3775_s14, 4  ;;  %s3622_s28 = int_to_ptr.vmem [resolvable:$false] %s3621_s28 }
  0x6c   : > { %s3623_s10 = scalar_lea.vmem %s3622_s28, 2048  ;;  %p3624_p1 = scmp.lt.s32.totalorder %s3988_s7, %s3622_s28 }
  0x6d   : > { %p3619_p7 = pnand %p3617_p13, %p3939_p12  ;;  %p3625_p8 = scmp.lt.s32.totalorder %s3623_s10, %s3616_s12 }
  0x6f   : > { %p3620_p3 = pneg %p3619_p7  ;;  %p3626_p10 = por %p3625_p8, %p3624_p1 }
  0x71   : > { %p3627_p2 = pnand %p3626_p10, %p3620_p3 }
  0x73   : > { %3630 = shalt.err (!%p3627_p2)
}
  0x74   : > { %s3776_s17 = smov 512   ;;  %s3777_s27 = smov 32  }
  0x75   : > { %3397 = dma.hbm_to_vmem [thread:$0]  (!%p4557_p11), %s3984_s21, 1024, %s3988_s7, %s233_s1, %s3776_s17, %s3776_s17, %s3777_s27  }
  0x76   : > { %s4022_s14 = scalar_lea.hbm %s4521_s2, %s3193_s23  ;;  %s279_s28 = scalar_lea.vmem [#allocation7], %s3104_s30 }
  0x77   : > { %s287_s10 = sshll.u32 %s279_s28, 4  ;;  %s3631_s26 = scalar_lea.hbm %s4022_s14, 1024  ;;  %s4026_s10 = int_to_ptr.vmem [resolvable:$true] %s287_s10 }
  0x78   : > { %p3632_p9 = scmp.ne.s32.totalorder %s4022_s14, %s3631_s26  ;;  %s3636_s1 = scalar_lea.hbm %s4521_s2, 2048 }
  0x79   : > { %p3637_p0 = scmp.lt.u32.totalorder %s4022_s14, %s4521_s2  ;;  %p3638_p6 = scmp.lt.u32.totalorder %s3636_s1, %s3631_s26 }
  0x7a   : > { %p3634_p4 = pnand %p3632_p9, %p3939_p12  ;;  %p3640_p7 = scmp.lt.u32.totalorder %s3631_s26, %s4022_s14 }
  0x7b   : > { %p3639_p13 = por %p3638_p6, %p3637_p0 }
  0x7c   : > { %p3635_p5 = pneg %p3634_p4 }
  0x7d   : > { %p3641_p3 = por %p3640_p7, %p3639_p13 }
  0x7f   : > { %p3642_p1 = pnand %p3641_p3, %p3635_p5 }
  0x81   : > { %3645 = shalt.err (!%p3642_p1)
}
  0x82   : > { %s3646_s30 = scalar_lea.vmem %s4026_s10, 1024  ;;  %s3778_s15 = smov [#allocation7]  }
  0x83   : > { %p3647_p8 = scmp.ne.s32.totalorder %s4026_s10, %s3646_s30  ;;  %s3651_s12 = sshll.u32 %s3778_s15, 4  ;;  %s3652_s12 = int_to_ptr.vmem [resolvable:$false] %s3651_s12 }
  0x84   : > { %s3653_s28 = scalar_lea.vmem %s3652_s12, 2048  ;;  %p3654_p9 = scmp.lt.s32.totalorder %s4026_s10, %s3652_s12 }
  0x85   : > { %p3649_p10 = pnand %p3647_p8, %p3939_p12  ;;  %p3655_p4 = scmp.lt.s32.totalorder %s3653_s28, %s3646_s30 }
  0x87   : > { %p3650_p2 = pneg %p3649_p10  ;;  %p3656_p0 = por %p3655_p4, %p3654_p9 }
  0x89   : > { %p3657_p6 = pnand %p3656_p0, %p3650_p2 }
  0x8b   : > { %3660 = shalt.err (!%p3657_p6)
}
  0x8c   : > { %3403 = dma.hbm_to_vmem [thread:$0]  (!%p4557_p11), %s4022_s14, 1024, %s4026_s10, %s3933_s18, %s3776_s17, %s3776_s17, %s3777_s27  }
  0x8d   : > { %s4561_s26 = sand.u32 1, %s3769_s24   ;;  %s3661_s7 = scalar_lea.hbm %s3971_s29, 256 }
  0x8e   : > { %s4055_s21 = scalar_lea.sflag [#allocation9], %s4561_s26  ;;  %p3662_p5 = scmp.ne.s32.totalorder %s3971_s29, %s3661_s7 }
  0x8f   : > { %s3666_s20 = scalar_lea.hbm %s4522_s3, 512  ;;  %p3667_p3 = scmp.lt.u32.totalorder %s3971_s29, %s4522_s3 }
  0x90   : > { %p3664_p13 = pnand %p3662_p5, %p3939_p12  ;;  %p3668_p1 = scmp.lt.u32.totalorder %s3666_s20, %s3661_s7 }
  0x91   : > { %p3670_p10 = scmp.lt.u32.totalorder %s3661_s7, %s3971_s29 }
  0x92   : > { %p3665_p7 = pneg %p3664_p13  ;;  %p3669_p8 = por %p3668_p1, %p3667_p3 }
  0x94   : > { %p3671_p2 = por %p3670_p10, %p3669_p8 }
  0x96   : > { %p3672_p9 = pnand %p3671_p2, %p3665_p7 }
  0x98   : > { %3675 = shalt.err (!%p3672_p9)
}
  0x99   : > { %s3676_s18 = scalar_lea.vmem %s3975_s4, 256  ;;  %s3779_s17 = smov [#allocation8]  }
  0x9a   : > { %p3677_p4 = scmp.ne.s32.totalorder %s3975_s4, %s3676_s18  ;;  %s3681_s27 = sshll.u32 %s3779_s17, 4  ;;  %s3682_s27 = int_to_ptr.vmem [resolvable:$false] %s3681_s27 }
  0x9b   : > { %s3683_s14 = scalar_lea.vmem %s3682_s27, 512  ;;  %p3684_p5 = scmp.lt.s32.totalorder %s3975_s4, %s3682_s27 }
  0x9c   : > { %p3679_p0 = pnand %p3677_p4, %p3939_p12  ;;  %p3685_p13 = scmp.lt.s32.totalorder %s3683_s14, %s3676_s18 }
  0x9e   : > { %p3680_p6 = pneg %p3679_p0  ;;  %p3686_p3 = por %p3685_p13, %p3684_p5 }
  0xa0   : > { %p3687_p1 = pnand %p3686_p3, %p3680_p6 }
  0xa2   : > { %3690 = shalt.err (!%p3687_p1)
}
  0xa3   : > { %s4562_s10 = smov 128   ;;  %p4563_p12 = scmp.ne.s32.totalorder %s4551_s11, 0 }
  0xa4   : > { %3406 = dma.hbm_to_vmem [thread:$0]  (!%p4557_p11), %s3971_s29, 256, %s3975_s4, %s4055_s21, %s4562_s10, %s4562_s10, %s3774_s13  }
  0xa5   : > { %320 = sbr.rel (%p4563_p12) target bundleno = 5958 (0x1746), region = 44  ;;  %s4085_s19 = sand.u32 (!%p4563_p12), 1, %s3761_s22  }
  0xa6   : > { %s3119_s12 = sshll.u32 (!%p4563_p12), %s4085_s19, 6  ;;  %s323_s28 = scalar_lea.sflag (!%p4563_p12), [#allocation3], %s4085_s19 }
  0xa7   : > { %s4089_s26 = scalar_lea.vmem (!%p4563_p12), [#allocation2], %s3119_s12  ;;  %p4564_p7 = scmp.ne.s32.totalorder (!%p4563_p12), %s4547_s8, 0 }
  0xac   : > { %3736 = dma.done.wait (%p4564_p7), %s323_s28, 1024  }
  0xad   : > { %3738 = vsyncadd (%p4564_p7), %s323_s28, 4294966272  ;;  %s331_s4 = sand.u32 1, %s3839_s25   ;;  %s3120_s11 = sshll.u32 %s4085_s19, 4 }
  0xae   : > { %s332_s16 = scalar_lea.sflag [#allocation6], %s331_s4  ;;  %s4097_s13 = scalar_lea.vmem [#allocation5], %s3120_s11 }
  0xaf   : > { %3740 = dma.done.wait (%p4564_p7), %s332_s16, 1280  }
  0xb0   : > { %3742 = vsyncadd (%p4564_p7), %s332_s16, 4294966016  ;;  %s4103_s29 = scalar_lea.vmem [#allocation7], %s3119_s12  ;;  %s350_s21 = scalar_lea.sflag [#allocation9], %s331_s4 }
  0xb1   : > { %s4105_s7 = scalar_lea.vmem [#allocation8], %s3120_s11 }
  0xb2   : > { %3744 = dma.done.wait (%p4564_p7), %s350_s21, 256  }
  0xb3   : > { %3746 = vsyncadd (%p4564_p7), %s350_s21, 4294967040  ;;  %p4565_p11 = scmp.eq.s32.totalorder %s3839_s25, 0 }
  0xb5   : > { %3748 = dma.done.wait (%p4565_p11), [#allocation9], 512   ;;  %p4566_p8 = pmov %p4565_p11 }
  0xb6   : > { %v406_v0 = vld [vmem:[#allocation10] sm:$0xff]  ;;  %v407_v2 = vld [vmem:[#allocation10 + $0x8] sm:$0xff]  ;;  %v408_v8 = vld [vmem:[#allocation10 + $0x10] sm:$0xff]  ;;  %vm1155_vm0 = vcmask 64512   ;;  %v3780_v40 = vmov 0.0   ;;  %vm3781_vm1 = vmmov 0  }
  0xb7   : > { %3750 = vsyncadd (%p4566_p8), [#allocation9], 4294966784  ;;  %v413_v1 = vld [vmem:[%s4089_s26] sm:$0xff]  ;;  %v4116_v3 = vcombine.high %v406_v0, %v406_v0  ;;  %v4118_v4 = vcombine.low %v406_v0, %v406_v0  ;;  %v4122_v6 = vcombine.high %v407_v2, %v407_v2  ;;  %v414_v7 = vld [vmem:[%s4089_s26 + $0x8] sm:$0xff]  ;;  %v4134_v10 = vcombine.low %v407_v2, %v407_v2  ;;  %s3124_s15 = sshll.u32 %s4085_s19, 1  ;;  %s3189_s27 = sshll.u32 %s3839_s25, 5 }
  0xb8   : > { %v4120_v5 = vcombine.high %v413_v1, %v413_v1  ;;  %v4131_v9 = vcombine.low %v413_v1, %v413_v1  ;;  %v4136_v11 = vcombine.high %v414_v7, %v414_v7  ;;  %v4138_v12 = vcombine.high %v408_v8, %v408_v8  ;;  %v415_v13 = vld [vmem:[%s4089_s26 + $0x10] sm:$0xff]  ;;  %v409_v14 = vld [vmem:[#allocation10 + $0x18] sm:$0xff]  ;;  %v4189_v24 = vld [vmem:[%s4524_s5] ss:$0 sm:$0xff]  ;;  %s400_s10 = scalar_lea.vmem [#allocation11], %s3124_s15  ;;  %s4473_s4 = scalar_lea.hbm %s4525_s6, %s3189_s27 }
  0xb9   : > { %485 = vmatprep.subr.bf16.mxu0 %v4116_v3  ;;  %673 = vmatprep.subr.bf16.mxu1 %v4116_v3  ;;  %v4145_v15 = vcombine.low %v414_v7, %v414_v7  ;;  %v4147_v16 = vcombine.low %v408_v8, %v408_v8  ;;  %v4149_v17 = vcombine.high %v415_v13, %v415_v13  ;;  %v416_v19 = vld [vmem:[%s4089_s26 + $0x18] sm:$0xff]  ;;  %v4198_v43 = vld [vmem:[%s4097_s13] sm:$0xff]  ;;  %v419_v61 = vld [vmem:[%s4103_s29 + $0x8] sm:$0xff]  ;;  %vm1639_vm4 = vcmask 7168   ;;  %s2955_s12 = sshll.u32 %s400_s10, 4  ;;  %s2942_s25 = scalar_lea.sflag [#allocation4], %s4085_s19  ;;  %s4475_s12 = int_to_ptr.vmem [resolvable:$true] %s2955_s12 }
  0xba   : > { %517 = vmatprep.mubr.bf16.mxu0 %v4120_v5  ;;  %486 = vmatpush1.bf16.xpose.msra.mxu0 %v4118_v4  ;;  %v4151_v18 = vcombine.high %v409_v14, %v409_v14  ;;  %v4158_v20 = vcombine.low %v415_v13, %v415_v13  ;;  %v4160_v21 = vcombine.low %v409_v14, %v409_v14  ;;  %v418_v60 = vld [vmem:[%s4103_s29] sm:$0xff]  ;;  %v420_v1 = vld [vmem:[%s4103_s29 + $0x10] sm:$0xff]  ;;  %v421_v8 = vld [vmem:[%s4103_s29 + $0x18] sm:$0xff]  ;;  %vm1693_vm10 = vcmask 8192   ;;  %s3691_s11 = scalar_lea.vmem %s4475_s12, 32  ;;  %p4567_p2 = scmp.ne.s32.totalorder %s4548_s9, 0 }
  0xbb   : > { %525 = vmatprep.subr.bf16.mxu0 %v4122_v6  ;;  %674 = vmatpush1.bf16.xpose.msra.mxu1 %v4118_v4  ;;  %v4162_v22 = vcombine.high %v416_v19, %v416_v19  ;;  %v4168_v23 = vcombine.low %v416_v19, %v416_v19  ;;  %v3142_v62 = vcombine.low %v418_v60, %v418_v60  ;;  %p3692_p10 = scmp.ne.s32.totalorder %s4475_s12, %s3691_s11  ;;  %s3782_s16 = smov [#allocation11]  }
  0xbc   : > { %713 = vmatprep.subr.bf16.mxu1 %v4122_v6  ;;  %v3143_v63 = vcombine.high %v418_v60, %v418_v60  ;;  %v3145_v0 = vcombine.high %v419_v61, %v419_v61  ;;  %v3144_v2 = vcombine.low %v419_v61, %v419_v61  ;;  %v3147_v7 = vcombine.high %v420_v1, %v420_v1 }
  0xbd   : > { %v3146_v13 = vcombine.low %v420_v1, %v420_v1  ;;  %v3149_v14 = vcombine.high %v421_v8, %v421_v8  ;;  %v3148_v19 = vcombine.low %v421_v8, %v421_v8  ;;  %p3693_p9 = pnand %p3692_p10, %p4567_p2 }
  0xbe   : > { %705 = vmatprep.mubr.bf16.mxu1 %v3143_v63 }
  0xbf   : > { %p3694_p4 = pneg %p3693_p9 }
  0xc1   : > { %518 = vmatmul.mubr.bf16.vlgmr.msra.gmra.mrb[0].mxu0 %v4131_v9 }
  0xc2   : > { %526 = vmatpush1.bf16.xpose.msra.mxu0 %v4134_v10  ;;  %557 = vmatprep.mubr.bf16.mxu0 %v4136_v11 }
  0xc3   : > { %565 = vmatprep.subr.bf16.mxu0 %v4138_v12  ;;  %706 = vmatmul.mubr.bf16.vlgmr.msra.gmra.mrb[0].mxu1 %v3142_v62 }
  0xc4   : > { %714 = vmatpush1.bf16.xpose.msra.mxu1 %v4134_v10  ;;  %745 = vmatprep.mubr.bf16.mxu1 %v3145_v0 }
  0xc5   : > { %753 = vmatprep.subr.bf16.mxu1 %v4138_v12 }
  0xcd   : > { %558 = vmatmul.mubr.bf16.vlgmr.msra.gmra.mrb[0].mxu0 %v4145_v15 }
  0xce   : > { %566 = vmatpush1.bf16.xpose.msra.mxu0 %v4147_v16  ;;  %597 = vmatprep.mubr.bf16.mxu0 %v4149_v17 }
  0xcf   : > { %605 = vmatprep.subr.bf16.mxu0 %v4151_v18  ;;  %746 = vmatmul.mubr.bf16.vlgmr.msra.gmra.mrb[0].mxu1 %v3144_v2 }
  0xd0   : > { %754 = vmatpush1.bf16.xpose.msra.mxu1 %v4147_v16  ;;  %785 = vmatprep.mubr.bf16.mxu1 %v3147_v7 }
  0xd1   : > { %793 = vmatprep.subr.bf16.mxu1 %v4151_v18 }
  0xd9   : > { %598 = vmatmul.mubr.bf16.vlgmr.msra.gmra.mrb[0].mxu0 %v4158_v20 }
  0xda   : > { %606 = vmatpush1.bf16.xpose.msra.mxu0 %v4160_v21  ;;  %637 = vmatprep.mubr.bf16.mxu0 %v4162_v22 }
  0xdb   : > { %833 = vmatprep.subr.bf16.mxu0 %v4120_v5  ;;  %786 = vmatmul.mubr.bf16.vlgmr.msra.gmra.mrb[0].mxu1 %v3146_v13 }
  0xdc   : > { %794 = vmatpush1.bf16.xpose.msra.mxu1 %v4160_v21  ;;  %825 = vmatprep.mubr.bf16.mxu1 %v3149_v14 }
  0xdd   : > { %993 = vmatprep.subr.bf16.mxu1 %v4120_v5 }
  0xe5   : > { %638 = vmatmul.mubr.bf16.vlgmr.msra.gmra.mrb[0].mxu0 %v4168_v23 }
  0xe6   : > { %834 = vmatpush1.bf16.xpose.msra.mxu0 %v4131_v9  ;;  %865 = vmatprep.mubr.bf16.mxu0 %v4120_v5 }
  0xe7   : > { %873 = vmatprep.subr.bf16.mxu0 %v4136_v11  ;;  %826 = vmatmul.mubr.bf16.vlgmr.msra.gmra.mrb[0].mxu1 %v3148_v19 }
  0xe8   : > { %994 = vmatpush1.bf16.xpose.msra.mxu1 %v4131_v9  ;;  %1025 = vmatprep.mubr.bf16.mxu1 %v3143_v63 }
  0xe9   : > { %1033 = vmatprep.subr.bf16.mxu1 %v4136_v11 }
  0xed   : > { %866 = vmatmul.mubr.bf16.vlgmr.msra.gmra.mrb[4].mxu0 %v4131_v9 }
  0xee   : > { %874 = vmatpush1.bf16.xpose.msra.mxu0 %v4145_v15  ;;  %905 = vmatprep.mubr.bf16.mxu0 %v4136_v11 }
  0xef   : > { %913 = vmatprep.subr.bf16.mxu0 %v4149_v17  ;;  %1026 = vmatmul.mubr.bf16.vlgmr.msra.gmra.mrb[4].mxu1 %v3142_v62 }
  0xf0   : > { %1034 = vmatpush1.bf16.xpose.msra.mxu1 %v4145_v15  ;;  %1065 = vmatprep.mubr.bf16.mxu1 %v3145_v0 }
  0xf1   : > { %1073 = vmatprep.subr.bf16.mxu1 %v4149_v17 }
  0xf9   : > { %906 = vmatmul.mubr.bf16.vlgmr.msra.gmra.mrb[4].mxu0 %v4145_v15 }
  0xfa   : > { %914 = vmatpush1.bf16.xpose.msra.mxu0 %v4158_v20  ;;  %945 = vmatprep.mubr.bf16.mxu0 %v4149_v17 }
  0xfb   : > { %953 = vmatprep.subr.bf16.mxu0 %v4162_v22  ;;  %1066 = vmatmul.mubr.bf16.vlgmr.msra.gmra.mrb[4].mxu1 %v3144_v2 }
  0xfc   : > { %1074 = vmatpush1.bf16.xpose.msra.mxu1 %v4158_v20  ;;  %1105 = vmatprep.mubr.bf16.mxu1 %v3147_v7 }
  0xfd   : > { %1113 = vmatprep.subr.bf16.mxu1 %v4162_v22 }
 0x105   : > { %946 = vmatmul.mubr.bf16.vlgmr.msra.gmra.mrb[4].mxu0 %v4158_v20 }
 0x106   : > { %954 = vmatpush1.bf16.xpose.msra.mxu0 %v4168_v23  ;;  %985 = vmatprep.mubr.bf16.mxu0 %v4162_v22 }
 0x107   : > { %3218 = vmatprep.subr.mxu0 %v3780_v40  ;;  %1106 = vmatmul.mubr.bf16.vlgmr.msra.gmra.mrb[4].mxu1 %v3146_v13 }
 0x108   : > { %1114 = vmatpush1.bf16.xpose.msra.mxu1 %v4168_v23  ;;  %1145 = vmatprep.mubr.bf16.mxu1 %v3149_v14 }
 0x109   : > { %3223 = vmatprep.subr.mxu1 %v3780_v40 }
 0x111   : > { %986 = vmatmul.mubr.bf16.vlgmr.msra.gmra.mrb[4].mxu0 %v4168_v23 }
 0x112   : > { %3220 = vmatprep.mubr.msk.f32.mxu0 %vm3781_vm1, %v3780_v40 }
 0x113   : > { %1146 = vmatmul.mubr.bf16.vlgmr.msra.gmra.mrb[4].mxu1 %v3148_v19 }
 0x114   : > { %3225 = vmatprep.mubr.msk.f32.mxu1 %vm3781_vm1, %v3780_v40 }
 0x1b8   : > { %v639_v25 = vpop.f32.mrb[0].mxu0 }
 0x1b9   : > { %v3268_v26 = vadd.f32 %v4189_v24, %v639_v25  ;;  %v641_v27 = vpop.f32.mrb[1].mxu0 }
 0x1ba   : > { %v642_v28 = vpop.f32.mrb[2].mxu0  ;;  %v4239_v20 = vpop.f32.mrb[0].mxu1 }
 0x1bb   : > { %v643_v29 = vpop.f32.mrb[3].mxu0  ;;  %v1156_v30 = vsel %vm1155_vm0, %v3268_v26, -inf  ;;  %v829_v22 = vpop.f32.mrb[1].mxu1 }
 0x1bc   : > { %1157 = vmax.xlane.f32.xlu0 %v1156_v30  ;;  %v830_v23 = vpop.f32.mrb[2].mxu1 }
 0x1bd   : > { %v831_v25 = vpop.f32.mrb[3].mxu1 }
 0x1e4   : > { %v987_v31 = vpop.f32.mrb[4].mxu0 }
 0x1e5   : > { %v989_v32 = vpop.f32.mrb[5].mxu0  ;;  %v4203_v46 = vmul.f32 0.05, %v987_v31 }
 0x1e6   : > { %v990_v33 = vpop.f32.mrb[6].mxu0  ;;  %v4247_v30 = vpop.f32.mrb[4].mxu1 }
 0x1e7   : > { %v991_v34 = vpop.f32.mrb[7].mxu0  ;;  %v1149_v31 = vpop.f32.mrb[5].mxu1 }
 0x1e8   : > { %v1150_v32 = vpop.f32.mrb[6].mxu1 }
 0x1e9   : > { %v1151_v33 = vpop.f32.mrb[7].mxu1 }
 0x1ea   : > { %v3157_v33 = vld [vmem:[%s4089_s26 + $0x28] sm:$0xff] }
 0x249   : > { %v1158_v35 = vpop.xlane.xlu0 %1157 }
 0x24a   : > { %v1159_v36 = vsub.f32 %v3268_v26, %v1158_v35 }
 0x24c   : > { %v1160_v37 = vmul.f32 1.442695, %v1159_v36 }
 0x24e   : > { %3494 = vpow2.f32 %v1160_v37 }
 0x258   : > { %v3495_v38 = vpop.eup %3494 }
 0x259   : > { %v1162_v39 = vsel %vm1155_vm0, %v3495_v38, 0.0 }
 0x25a   : > { %1163 = vadd.xlane.f32.xlu0 %v1162_v39 }
 0x2e7   : > { %v1164_v41 = vpop.xlane.xlu0 %1163 }
 0x2e8   : > { %3496 = vrcp.f32 %v1164_v41 }
 0x2f2   : > { %v3497_v42 = vpop.eup %3496 }
 0x2f3   : > { %v1166_v44 = vmul.f32 %v3497_v42, %v3495_v38 }
 0x2f5   : > { %v4201_v45 = vsub.f32 %v1166_v44, %v4198_v43 }
 0x2f7   : > { %3219 = vmatpush3.msra.mxu0 %v4201_v45  ;;  %v1169_v47 = vsel %vm1155_vm0, %v4201_v45, 0.0 }
 0x2f8   : > { %3221 = vmatmul.mubr.msk.f32.vlgmr.msra.gmra.mrb[8].mxu0 %vm1155_vm0, %v4203_v46  ;;  %3228 = vmatprep.subr.mxu0 %v3780_v40  ;;  %v1170_v48 = vrot.slane %v1169_v47, 4 }
 0x2f9   : > { %3230 = vmatprep.mubr.msk.f32.mxu0 %vm3781_vm1, %v3780_v40 }
 0x2fa   : > { %v1171_v49 = vadd.f32 %v1170_v48, %v1169_v47 }
 0x2fc   : > { %v1172_v50 = vrot.slane %v1171_v49, 2 }
 0x2fe   : > { %v1173_v51 = vadd.f32 %v1172_v50, %v1171_v49 }
 0x300   : > { %v1174_v52 = vrot.slane %v1173_v51, 1 }
 0x302   : > { %v1175_v53 = vadd.f32 %v1174_v52, %v1173_v51 }
 0x304   : > { %v1176_v54 = vmul.f32 0.05, %v1175_v53 }
 0x3cb   : > { %v1246_v55 = vpop.f32.mrb[8].mxu0 }
 0x3cc   : > { %v1247_v56 = vadd.f32 %v1246_v55, %v1176_v54  ;;  %v3222_v57 = vpop.f32.mrb[9].mxu0 }
 0x3ce   : > { %v4213_v58 = vsub.f32 %v3268_v26, %v1247_v56 }
 0x3d0   : > { %v1251_v59 = vsel %vm1155_vm0, %v4213_v58, -inf }
 0x3d1   : > { %1252 = vmax.xlane.f32.xlu1 %v1251_v59 }
 0x45e   : > { %v1253_v5 = vpop.xlane.xlu1 %1252 }
 0x45f   : > { %v1254_v9 = vsub.f32 %v4213_v58, %v1253_v5 }
 0x461   : > { %v1255_v11 = vmul.f32 1.442695, %v1254_v9 }
 0x463   : > { %3498 = vpow2.f32 %v1255_v11 }
 0x46d   : > { %v3499_v15 = vpop.eup %3498 }
 0x46e   : > { %v1257_v17 = vsel %vm1155_vm0, %v3499_v15, 0.0 }
 0x46f   : > { %1258 = vadd.xlane.f32.xlu1 %v1257_v17 }
 0x4fc   : > { %v1259_v26 = vpop.xlane.xlu1 %1258 }
 0x4fd   : > { %3500 = vrcp.f32 %v1259_v26 }
 0x507   : > { %v3501_v27 = vpop.eup %3500 }
 0x508   : > { %v1261_v28 = vmul.f32 %v3501_v27, %v3499_v15  ;;  %v3156_v27 = vld [vmem:[%s4089_s26 + $0x20] sm:$0xff] }
 0x509   : > { %v4269_v31 = vcombine.high %v3156_v27, %v3156_v27 }
 0x50a   : > { %v1262_v29 = vsub.f32 %v1261_v28, %v4198_v43 }
 0x50c   : > { %3224 = vmatpush3.msra.mxu1 %v1262_v29  ;;  %v1264_v34 = vsel %vm1155_vm0, %v1262_v29, 0.0  ;;  %v1263_v60 = vadd.f32 %v1262_v29, %v4201_v45 }
 0x50d   : > { %3226 = vmatmul.mubr.msk.f32.vlgmr.msra.gmra.mrb[8].mxu1 %vm1155_vm0, %v4203_v46  ;;  %3233 = vmatprep.subr.mxu1 %v3780_v40  ;;  %v1265_v35 = vrot.slane %v1264_v34, 4 }
 0x50e   : > { %3235 = vmatprep.mubr.msk.f32.mxu1 %vm3781_vm1, %v3780_v40 }
 0x50f   : > { %v1266_v36 = vadd.f32 %v1265_v35, %v1264_v34  ;;  %v4280_v34 = vcombine.low %v3156_v27, %v3156_v27  ;;  %v4282_v35 = vcombine.high %v3157_v33, %v3157_v33  ;;  %v4339_v27 = vld [vmem:[%s4097_s13 + $0x8] sm:$0xff]  ;;  %s3695_s13 = sshll.u32 %s3782_s16, 4  ;;  %s3696_s13 = int_to_ptr.vmem [resolvable:$false] %s3695_s13 }
 0x510   : > { %p3698_p0 = scmp.lt.s32.totalorder %s4475_s12, %s3696_s13 }
 0x511   : > { %v1267_v37 = vrot.slane %v1266_v36, 2 }
 0x513   : > { %v1268_v38 = vadd.f32 %v1267_v37, %v1266_v36  ;;  %v4289_v36 = vcombine.low %v3157_v33, %v3157_v33 }
 0x515   : > { %v1269_v39 = vrot.slane %v1268_v38, 1 }
 0x517   : > { %v1270_v41 = vadd.f32 %v1269_v39, %v1268_v38  ;;  %v3159_v38 = vld [vmem:[%s4089_s26 + $0x38] sm:$0xff] }
 0x519   : > { %v1271_v42 = vmul.f32 0.05, %v1270_v41  ;;  %v4300_v41 = vcombine.high %v3159_v38, %v3159_v38 }
 0x5e0   : > { %v1338_v44 = vpop.f32.mrb[8].mxu1 }
 0x5e1   : > { %v1339_v47 = vadd.f32 %v1338_v44, %v1271_v42  ;;  %v3227_v48 = vpop.f32.mrb[9].mxu1  ;;  %v4306_v42 = vcombine.low %v3159_v38, %v3159_v38 }
 0x5e3   : > { %v1342_v49 = vsub.f32 %v4213_v58, %v1339_v47 }
 0x5e5   : > { %v1343_v50 = vsel %vm1155_vm0, %v1342_v49, -inf }
 0x5e6   : > { %1344 = vmax.xlane.f32.xlu0 %v1343_v50 }
 0x673   : > { %v1345_v51 = vpop.xlane.xlu0 %1344 }
 0x674   : > { %v1346_v52 = vsub.f32 %v1342_v49, %v1345_v51 }
 0x676   : > { %v1347_v53 = vmul.f32 1.442695, %v1346_v52 }
 0x678   : > { %3502 = vpow2.f32 %v1347_v53 }
 0x682   : > { %v3503_v54 = vpop.eup %3502 }
 0x683   : > { %v1349_v55 = vsel %vm1155_vm0, %v3503_v54, 0.0 }
 0x684   : > { %1350 = vadd.xlane.f32.xlu1 %v1349_v55 }
 0x711   : > { %v1351_v56 = vpop.xlane.xlu1 %1350 }
 0x712   : > { %3504 = vrcp.f32 %v1351_v56 }
 0x71c   : > { %v3505_v57 = vpop.eup %3504 }
 0x71d   : > { %v1353_v59 = vmul.f32 %v3505_v57, %v3503_v54 }
 0x71f   : > { %v1354_v61 = vsub.f32 %v1353_v59, %v4198_v43 }
 0x721   : > { %3229 = vmatpush3.msra.mxu0 %v1354_v61  ;;  %v1355_v58 = vadd.f32 %v1354_v61, %v1263_v60  ;;  %v1356_v62 = vsel %vm1155_vm0, %v1354_v61, 0.0 }
 0x722   : > { %3231 = vmatmul.mubr.msk.f32.vlgmr.msra.gmra.mrb[10].mxu0 %vm1155_vm0, %v4203_v46  ;;  %3238 = vmatprep.subr.mxu0 %v3780_v40  ;;  %v1357_v63 = vrot.slane %v1356_v62, 4 }
 0x723   : > { %3240 = vmatprep.mubr.msk.f32.mxu0 %vm3781_vm1, %v3780_v40 }
 0x724   : > { %v1358_v0 = vadd.f32 %v1357_v63, %v1356_v62 }
 0x726   : > { %v1359_v1 = vrot.slane %v1358_v0, 2 }
 0x728   : > { %v1360_v2 = vadd.f32 %v1359_v1, %v1358_v0 }
 0x72a   : > { %v1361_v7 = vrot.slane %v1360_v2, 1 }
 0x72c   : > { %v1362_v45 = vadd.f32 %v1361_v7, %v1360_v2 }
 0x72e   : > { %v1363_v8 = vmul.f32 0.05, %v1362_v45 }
 0x7f5   : > { %v1430_v13 = vpop.f32.mrb[10].mxu0 }
 0x7f6   : > { %v1431_v14 = vadd.f32 %v1430_v13, %v1363_v8  ;;  %v3232_v19 = vpop.f32.mrb[11].mxu0 }
 0x7f8   : > { %v4261_v5 = vsub.f32 %v1342_v49, %v1431_v14 }
 0x7fa   : > { %v1435_v9 = vsel %vm1155_vm0, %v4261_v5, -inf }
 0x7fb   : > { %1436 = vmax.xlane.f32.xlu0 %v1435_v9 }
 0x888   : > { %v1437_v11 = vpop.xlane.xlu0 %1436 }
 0x889   : > { %v1438_v15 = vsub.f32 %v4261_v5, %v1437_v11 }
 0x88b   : > { %v1439_v17 = vmul.f32 1.442695, %v1438_v15 }
 0x88d   : > { %3506 = vpow2.f32 %v1439_v17 }
 0x897   : > { %v3507_v22 = vpop.eup %3506 }
 0x898   : > { %v1441_v23 = vsel %vm1155_vm0, %v3507_v22, 0.0 }
 0x899   : > { %1442 = vadd.xlane.f32.xlu1 %v1441_v23 }
 0x926   : > { %v1443_v25 = vpop.xlane.xlu1 %1442 }
 0x927   : > { %3508 = vrcp.f32 %v1443_v25 }
 0x931   : > { %v3509_v26 = vpop.eup %3508 }
 0x932   : > { %v1445_v28 = vmul.f32 %v3509_v26, %v3507_v22 }
 0x934   : > { %v1446_v29 = vsub.f32 %v1445_v28, %v4198_v43 }
 0x936   : > { %3234 = vmatpush3.msra.mxu1 %v1446_v29  ;;  %v4271_v32 = vadd.f32 %v1446_v29, %v1355_v58  ;;  %v1448_v44 = vsel %vm1155_vm0, %v1446_v29, 0.0 }
 0x937   : > { %3236 = vmatmul.mubr.msk.f32.vlgmr.msra.gmra.mrb[10].mxu1 %vm1155_vm0, %v4203_v46  ;;  %1737 = vmatprep.subr.bf16.mxu1 %v4116_v3  ;;  %v3158_v46 = vld [vmem:[%s4089_s26 + $0x30] sm:$0xff]  ;;  %v1449_v47 = vrot.slane %v1448_v44, 4 }
 0x938   : > { %1769 = vmatprep.mubr.bf16.mxu1 %v4269_v31  ;;  %v4291_v37 = vcombine.high %v3158_v46, %v3158_v46  ;;  %v4298_v39 = vcombine.low %v3158_v46, %v3158_v46 }
 0x939   : > { %v1450_v48 = vadd.f32 %v1449_v47, %v1448_v44 }
 0x93b   : > { %v1451_v49 = vrot.slane %v1450_v48, 2 }
 0x93d   : > { %1738 = vmatpush1.bf16.xpose.msra.mxu1 %v4118_v4  ;;  %v1452_v50 = vadd.f32 %v1451_v49, %v1450_v48  ;;  %v1154_v48 = vmul.f32 0.05, %v4247_v30 }
 0x93e   : > { %1777 = vmatprep.subr.bf16.mxu1 %v4122_v6 }
 0x93f   : > { %v1453_v51 = vrot.slane %v1452_v50, 1 }
 0x941   : > { %v1454_v52 = vadd.f32 %v1453_v51, %v1452_v50 }
 0x943   : > { %v1455_v53 = vmul.f32 0.05, %v1454_v52 }
 0x944   : > { %1770 = vmatmul.mubr.bf16.vlgmr.msra.gmra.mrb[12].mxu1 %v4280_v34 }
 0x945   : > { %1778 = vmatpush1.bf16.xpose.msra.mxu1 %v4134_v10  ;;  %1809 = vmatprep.mubr.bf16.mxu1 %v4282_v35 }
 0x946   : > { %1817 = vmatprep.subr.bf16.mxu1 %v4138_v12 }
 0x950   : > { %1810 = vmatmul.mubr.bf16.vlgmr.msra.gmra.mrb[12].mxu1 %v4289_v36 }
 0x951   : > { %1818 = vmatpush1.bf16.xpose.msra.mxu1 %v4147_v16  ;;  %1849 = vmatprep.mubr.bf16.mxu1 %v4291_v37 }
 0x952   : > { %1857 = vmatprep.subr.bf16.mxu1 %v4151_v18 }
 0x95c   : > { %1850 = vmatmul.mubr.bf16.vlgmr.msra.gmra.mrb[12].mxu1 %v4298_v39 }
 0x95d   : > { %1858 = vmatpush1.bf16.xpose.msra.mxu1 %v4160_v21  ;;  %1889 = vmatprep.mubr.bf16.mxu1 %v4300_v41 }
 0x95e   : > { %2085 = vmatprep.subr.bf16.mxu1 %v4269_v31 }
 0x968   : > { %1890 = vmatmul.mubr.bf16.vlgmr.msra.gmra.mrb[12].mxu1 %v4306_v42 }
 0x969   : > { %2086 = vmatpush1.bf16.xpose.msra.mxu1 %v4280_v34  ;;  %2117 = vmatprep.mubr.bf16.mxu1 %v4269_v31 }
 0x96a   : > { %2125 = vmatprep.subr.bf16.mxu1 %v4282_v35 }
 0x970   : > { %2118 = vmatmul.mubr.bf16.vlgmr.msra.gmra.mrb[16].mxu1 %v4280_v34 }
 0x971   : > { %2126 = vmatpush1.bf16.xpose.msra.mxu1 %v4289_v36  ;;  %2157 = vmatprep.mubr.bf16.mxu1 %v4282_v35 }
 0x972   : > { %2165 = vmatprep.subr.bf16.mxu1 %v4291_v37 }
 0x97c   : > { %2158 = vmatmul.mubr.bf16.vlgmr.msra.gmra.mrb[16].mxu1 %v4289_v36 }
 0x97d   : > { %2166 = vmatpush1.bf16.xpose.msra.mxu1 %v4298_v39  ;;  %2197 = vmatprep.mubr.bf16.mxu1 %v4291_v37 }
 0x97e   : > { %2205 = vmatprep.subr.bf16.mxu1 %v4300_v41 }
 0x988   : > { %2198 = vmatmul.mubr.bf16.vlgmr.msra.gmra.mrb[16].mxu1 %v4298_v39 }
 0x989   : > { %2206 = vmatpush1.bf16.xpose.msra.mxu1 %v4306_v42  ;;  %2237 = vmatprep.mubr.bf16.mxu1 %v4300_v41 }
 0x98a   : > { %3243 = vmatprep.subr.mxu1 %v3780_v40 }
 0x994   : > { %2238 = vmatmul.mubr.bf16.vlgmr.msra.gmra.mrb[16].mxu1 %v4306_v42 }
 0x995   : > { %3245 = vmatprep.mubr.msk.f32.mxu1 %vm3781_vm1, %v3780_v40 }
 0xa0a   : > { %v1522_v54 = vpop.f32.mrb[10].mxu1 }
 0xa0b   : > { %v1523_v55 = vadd.f32 %v1522_v54, %v1455_v53  ;;  %v3237_v56 = vpop.f32.mrb[11].mxu1 }
 0xa0d   : > { %v1526_v63 = vsub.f32 %v4261_v5, %v1523_v55 }
 0xa0f   : > { %v1527_v0 = vsel %vm1155_vm0, %v1526_v63, -inf }
 0xa3b   : > { %v1891_v57 = vpop.f32.mrb[12].mxu1 }
 0xa3c   : > { %v4329_v59 = vadd.f32 %v4189_v24, %v1891_v57  ;;  %v1893_v60 = vpop.f32.mrb[13].mxu1 }
 0xa3d   : > { %v1894_v61 = vpop.f32.mrb[14].mxu1 }
 0xa3e   : > { %v1895_v58 = vpop.f32.mrb[15].mxu1  ;;  %v2407_v62 = vsel %vm1155_vm0, %v4329_v59, -inf }
 0xa3f   : > { %2408 = vmax.xlane.f32.xlu0 %v2407_v62 }
 0xa43   : > { %1528 = vmax.xlane.f32.xlu0 %v1527_v0 }
 0xa67   : > { %v2239_v1 = vpop.f32.mrb[16].mxu1 }
 0xa68   : > { %v2241_v2 = vpop.f32.mrb[17].mxu1  ;;  %v4344_v46 = vmul.f32 0.05, %v2239_v1 }
 0xa69   : > { %v2242_v7 = vpop.f32.mrb[18].mxu1  ;;  %v3269_v2 = vadd.f32 %v4189_v24, %v4239_v20  ;;  %v3164_v20 = vld [vmem:[%s4103_s29 + $0x38] sm:$0xff] }
 0xa6a   : > { %v2243_v45 = vpop.f32.mrb[19].mxu1 }
 0xacc   : > { %v2409_v8 = vpop.xlane.xlu0 %2408 }
 0xacd   : > { %v2410_v13 = vsub.f32 %v4329_v59, %v2409_v8 }
 0xacf   : > { %v2411_v14 = vmul.f32 1.442695, %v2410_v13  ;;  %v3161_v13 = vld [vmem:[%s4103_s29 + $0x20] sm:$0xff] }
 0xad0   : > { %v1529_v19 = vpop.xlane.xlu0 %1528 }
 0xad1   : > { %3510 = vpow2.f32 %v2411_v14  ;;  %v1530_v9 = vsub.f32 %v1526_v63, %v1529_v19  ;;  %v3162_v14 = vld [vmem:[%s4103_s29 + $0x28] sm:$0xff]  ;;  %v3174_v19 = vcombine.low %v3161_v13, %v3161_v13 }
 0xad3   : > { %v1531_v11 = vmul.f32 1.442695, %v1530_v9  ;;  %v3177_v9 = vcombine.high %v3162_v14, %v3162_v14 }
 0xad5   : > { %3512 = vpow2.f32 %v1531_v11  ;;  %v3163_v11 = vld [vmem:[%s4103_s29 + $0x30] sm:$0xff]  ;;  %s3697_s29 = scalar_lea.vmem %s3696_s13, 64 }
 0xad6   : > { %v3179_v24 = vcombine.high %v3163_v11, %v3163_v11  ;;  %p3699_p6 = scmp.lt.s32.totalorder %s3697_s29, %s3691_s11 }
 0xad8   : > { %p3700_p5 = por %p3699_p6, %p3698_p0 }
 0xada   : > { %p3701_p13 = pnand %p3700_p5, %p3694_p4 }
 0xadb   : > { %v3511_v15 = vpop.eup %3510 }
 0xadc   : > { %v2413_v5 = vsel %vm1155_vm0, %v3511_v15, 0.0 }
 0xadd   : > { %2414 = vadd.xlane.f32.xlu1 %v2413_v5  ;;  %v3178_v5 = vcombine.low %v3163_v11, %v3163_v11 }
 0xadf   : > { %v3513_v17 = vpop.eup %3512 }
 0xae0   : > { %v1533_v22 = vsel %vm1155_vm0, %v3513_v17, 0.0 }
 0xae1   : > { %1534 = vadd.xlane.f32.xlu1 %v1533_v22 }
 0xb6a   : > { %v2415_v23 = vpop.xlane.xlu1 %2414 }
 0xb6b   : > { %3514 = vrcp.f32 %v2415_v23 }
 0xb6e   : > { %v1535_v25 = vpop.xlane.xlu1 %1534 }
 0xb6f   : > { %3516 = vrcp.f32 %v1535_v25 }
 0xb75   : > { %v3515_v26 = vpop.eup %3514 }
 0xb76   : > { %v2417_v28 = vmul.f32 %v3515_v26, %v3511_v15  ;;  %v3176_v15 = vcombine.low %v3162_v14, %v3162_v14 }
 0xb78   : > { %v4342_v29 = vsub.f32 %v2417_v28, %v4339_v27 }
 0xb79   : > { %v3517_v33 = vpop.eup %3516 }
 0xb7a   : > { %3244 = vmatpush3.msra.mxu1 %v4342_v29  ;;  %v1537_v38 = vmul.f32 %v3517_v33, %v3513_v17  ;;  %v2420_v49 = vsel %vm1155_vm0, %v4342_v29, 0.0  ;;  %v3181_v17 = vcombine.high %v3164_v20, %v3164_v20 }
 0xb7b   : > { %3246 = vmatmul.mubr.msk.f32.vlgmr.msra.gmra.mrb[20].mxu1 %vm1155_vm0, %v4344_v46  ;;  %3253 = vmatprep.subr.mxu1 %v3780_v40 }
 0xb7c   : > { %v1538_v44 = vsub.f32 %v1537_v38, %v4198_v43  ;;  %3255 = vmatprep.mubr.msk.f32.mxu1 %vm3781_vm1, %v3780_v40  ;;  %v2421_v43 = vrot.slane %v2420_v49, 4 }
 0xb7e   : > { %v1539_v47 = vadd.f32 %v1538_v44, %v4271_v32  ;;  %v2422_v51 = vadd.f32 %v2421_v43, %v2420_v49 }
 0xb80   : > { %3239 = vmatpush3.msra.mxu0 %v1539_v47  ;;  %v1540_v50 = vsel %vm1155_vm0, %v1539_v47, 0.0  ;;  %v2423_v32 = vrot.slane %v2422_v51, 2 }
 0xb81   : > { %3241 = vmatmul.mubr.msk.f32.vlgmr.msra.gmra.mrb[12].mxu0 %vm1155_vm0, %v1154_v48  ;;  %1925 = vmatprep.subr.bf16.mxu0 %v4116_v3  ;;  %v1541_v52 = vrot.slane %v1540_v50, 4 }
 0xb82   : > { %v2424_v30 = vadd.f32 %v2423_v32, %v2422_v51 }
 0xb83   : > { %v1542_v53 = vadd.f32 %v1541_v52, %v1540_v50 }
 0xb84   : > { %v2425_v55 = vrot.slane %v2424_v30, 1 }
 0xb85   : > { %v1543_v54 = vrot.slane %v1542_v53, 2 }
 0xb86   : > { %v2426_v57 = vadd.f32 %v2425_v55, %v2424_v30 }
 0xb87   : > { %1926 = vmatpush1.bf16.xpose.msra.mxu0 %v4118_v4  ;;  %v1544_v56 = vadd.f32 %v1543_v54, %v1542_v53 }
 0xb88   : > { %1965 = vmatprep.subr.bf16.mxu0 %v4122_v6  ;;  %v2427_v4 = vmul.f32 0.05, %v2426_v57 }
 0xb89   : > { %v1545_v3 = vrot.slane %v1544_v56, 1 }
 0xb8b   : > { %v1546_v58 = vadd.f32 %v1545_v3, %v1544_v56 }
 0xb8d   : > { %v1547_v0 = vmul.f32 0.05, %v1546_v58 }
 0xc4e   : > { %v2497_v6 = vpop.f32.mrb[20].mxu1 }
 0xc4f   : > { %v2498_v60 = vadd.f32 %v2497_v6, %v2427_v4  ;;  %v3247_v61 = vpop.f32.mrb[21].mxu1 }
 0xc51   : > { %v4363_v62 = vsub.f32 %v4329_v59, %v2498_v60  ;;  %v3175_v59 = vcombine.high %v3161_v13, %v3161_v13 }
 0xc53   : > { %v2502_v63 = vsel %vm1155_vm0, %v4363_v62, -inf  ;;  %1957 = vmatprep.mubr.bf16.mxu0 %v3175_v59 }
 0xc54   : > { %2503 = vmax.xlane.f32.xlu0 %v2502_v63  ;;  %v1617_v1 = vpop.f32.mrb[12].mxu0  ;;  %1958 = vmatmul.mubr.bf16.vlgmr.msra.gmra.mrb[16].mxu0 %v3174_v19 }
 0xc55   : > { %v1618_v7 = vadd.f32 %v1617_v1, %v1547_v0  ;;  %v3242_v45 = vpop.f32.mrb[13].mxu0  ;;  %1966 = vmatpush1.bf16.xpose.msra.mxu0 %v4134_v10  ;;  %1997 = vmatprep.mubr.bf16.mxu0 %v3177_v9  ;;  %v3180_v10 = vcombine.low %v3164_v20, %v3164_v20 }
 0xc56   : > { %2005 = vmatprep.subr.bf16.mxu0 %v4138_v12 }
 0xc57   : > { %v4369_v8 = vsub.f32 %v3269_v2, %v1618_v7 }
 0xc60   : > { %1998 = vmatmul.mubr.bf16.vlgmr.msra.gmra.mrb[16].mxu0 %v3176_v15 }
 0xc61   : > { %2006 = vmatpush1.bf16.xpose.msra.mxu0 %v4147_v16  ;;  %2037 = vmatprep.mubr.bf16.mxu0 %v3179_v24 }
 0xc62   : > { %2045 = vmatprep.subr.bf16.mxu0 %v4151_v18 }
 0xc6c   : > { %2038 = vmatmul.mubr.bf16.vlgmr.msra.gmra.mrb[16].mxu0 %v3178_v5 }
 0xc6d   : > { %2046 = vmatpush1.bf16.xpose.msra.mxu0 %v4160_v21  ;;  %2077 = vmatprep.mubr.bf16.mxu0 %v3181_v17 }
 0xc6e   : > { %2245 = vmatprep.subr.bf16.mxu0 %v4269_v31 }
 0xc78   : > { %2078 = vmatmul.mubr.bf16.vlgmr.msra.gmra.mrb[16].mxu0 %v3180_v10 }
 0xc79   : > { %2246 = vmatpush1.bf16.xpose.msra.mxu0 %v4280_v34  ;;  %2277 = vmatprep.mubr.bf16.mxu0 %v3175_v59 }
 0xc7a   : > { %2285 = vmatprep.subr.bf16.mxu0 %v4282_v35 }
 0xc80   : > { %2278 = vmatmul.mubr.bf16.vlgmr.msra.gmra.mrb[20].mxu0 %v3174_v19 }
 0xc81   : > { %2286 = vmatpush1.bf16.xpose.msra.mxu0 %v4289_v36  ;;  %2317 = vmatprep.mubr.bf16.mxu0 %v3177_v9 }
 0xc82   : > { %2325 = vmatprep.subr.bf16.mxu0 %v4291_v37 }
 0xc8c   : > { %2318 = vmatmul.mubr.bf16.vlgmr.msra.gmra.mrb[20].mxu0 %v3176_v15 }
 0xc8d   : > { %2326 = vmatpush1.bf16.xpose.msra.mxu0 %v4298_v39  ;;  %2357 = vmatprep.mubr.bf16.mxu0 %v3179_v24 }
 0xc8e   : > { %2365 = vmatprep.subr.bf16.mxu0 %v4300_v41 }
 0xc98   : > { %2358 = vmatmul.mubr.bf16.vlgmr.msra.gmra.mrb[20].mxu0 %v3178_v5 }
 0xc99   : > { %2366 = vmatpush1.bf16.xpose.msra.mxu0 %v4306_v42  ;;  %2397 = vmatprep.mubr.bf16.mxu0 %v3181_v17 }
 0xc9a   : > { %3248 = vmatprep.subr.mxu0 %v3780_v40 }
 0xca4   : > { %2398 = vmatmul.mubr.bf16.vlgmr.msra.gmra.mrb[20].mxu0 %v3180_v10 }
 0xca5   : > { %3250 = vmatprep.mubr.msk.f32.mxu0 %vm3781_vm1, %v3780_v40 }
 0xce1   : > { %v2504_v12 = vpop.xlane.xlu0 %2503 }
 0xce2   : > { %v2505_v16 = vsub.f32 %v4363_v62, %v2504_v12 }
 0xce4   : > { %v2506_v18 = vmul.f32 1.442695, %v2505_v16 }
 0xce6   : > { %3518 = vpow2.f32 %v2506_v18 }
 0xcf0   : > { %v3519_v21 = vpop.eup %3518 }
 0xcf1   : > { %v2508_v31 = vsel %vm1155_vm0, %v3519_v21, 0.0 }
 0xcf2   : > { %2509 = vadd.xlane.f32.xlu1 %v2508_v31 }
 0xd4b   : > { %v4393_v34 = vpop.f32.mrb[16].mxu0 }
 0xd4c   : > { %v2081_v35 = vpop.f32.mrb[17].mxu0 }
 0xd4d   : > { %v2082_v36 = vpop.f32.mrb[18].mxu0 }
 0xd4e   : > { %v2083_v37 = vpop.f32.mrb[19].mxu0 }
 0xd77   : > { %v4401_v23 = vpop.f32.mrb[20].mxu0 }
 0xd78   : > { %v2401_v25 = vpop.f32.mrb[21].mxu0 }
 0xd79   : > { %v2402_v26 = vpop.f32.mrb[22].mxu0 }
 0xd7a   : > { %v2403_v28 = vpop.f32.mrb[23].mxu0 }
 0xd7f   : > { %v2510_v39 = vpop.xlane.xlu1 %2509 }
 0xd80   : > { %3520 = vrcp.f32 %v2510_v39 }
 0xd8a   : > { %v3521_v41 = vpop.eup %3520 }
 0xd8b   : > { %v2512_v42 = vmul.f32 %v3521_v41, %v3519_v21 }
 0xd8d   : > { %v2513_v22 = vsub.f32 %v2512_v42, %v4339_v27 }
 0xd8f   : > { %3249 = vmatpush3.msra.mxu0 %v2513_v22  ;;  %v2515_v33 = vsel %vm1155_vm0, %v2513_v22, 0.0  ;;  %v2514_v61 = vadd.f32 %v2513_v22, %v4342_v29 }
 0xd90   : > { %3251 = vmatmul.mubr.msk.f32.vlgmr.msra.gmra.mrb[14].mxu0 %vm1155_vm0, %v4344_v46  ;;  %3258 = vmatprep.subr.mxu0 %v3780_v40  ;;  %v2516_v38 = vrot.slane %v2515_v33, 4 }
 0xd91   : > { %3260 = vmatprep.mubr.msk.f32.mxu0 %vm3781_vm1, %v3780_v40 }
 0xd92   : > { %v2517_v44 = vadd.f32 %v2516_v38, %v2515_v33 }
 0xd94   : > { %v2518_v47 = vrot.slane %v2517_v44, 2 }
 0xd96   : > { %v2519_v48 = vadd.f32 %v2518_v47, %v2517_v44  ;;  %v1622_v44 = vsel %vm1155_vm0, %v4369_v8, -inf }
 0xd98   : > { %v2520_v49 = vrot.slane %v2519_v48, 1 }
 0xd9a   : > { %v2521_v43 = vadd.f32 %v2520_v49, %v2519_v48 }
 0xd9c   : > { %v2522_v50 = vmul.f32 0.05, %v2521_v43 }
 0xe63   : > { %v2589_v51 = vpop.f32.mrb[14].mxu0 }
 0xe64   : > { %v2590_v52 = vadd.f32 %v2589_v51, %v2522_v50  ;;  %v3252_v32 = vpop.f32.mrb[15].mxu0 }
 0xe66   : > { %v2593_v53 = vsub.f32 %v4363_v62, %v2590_v52 }
 0xe68   : > { %v2594_v30 = vsel %vm1155_vm0, %v2593_v53, -inf }
 0xe69   : > { %2595 = vmax.xlane.f32.xlu0 %v2594_v30 }
 0xef6   : > { %v2596_v54 = vpop.xlane.xlu0 %2595 }
 0xef7   : > { %v2597_v55 = vsub.f32 %v2593_v53, %v2596_v54 }
 0xef9   : > { %v2598_v56 = vmul.f32 1.442695, %v2597_v55 }
 0xefb   : > { %3522 = vpow2.f32 %v2598_v56 }
 0xf05   : > { %v3523_v57 = vpop.eup %3522 }
 0xf06   : > { %v2600_v3 = vsel %vm1155_vm0, %v3523_v57, 0.0 }
 0xf07   : > { %2601 = vadd.xlane.f32.xlu1 %v2600_v3 }
 0xf94   : > { %v2602_v4 = vpop.xlane.xlu1 %2601 }
 0xf95   : > { %3524 = vrcp.f32 %v2602_v4 }
 0xf9f   : > { %v3525_v6 = vpop.eup %3524 }
 0xfa0   : > { %v2604_v60 = vmul.f32 %v3525_v6, %v3523_v57  ;;  %v4433_v6 = vld [vmem:[%s4105_s7] sm:$0xff] }
 0xfa2   : > { %v2605_v58 = vsub.f32 %v2604_v60, %v4339_v27 }
 0xfa4   : > { %3254 = vmatpush3.msra.mxu1 %v2605_v58  ;;  %v2606_v62 = vadd.f32 %v2605_v58, %v2514_v61  ;;  %v2607_v63 = vsel %vm1155_vm0, %v2605_v58, 0.0 }
 0xfa5   : > { %3256 = vmatmul.mubr.msk.f32.vlgmr.msra.gmra.mrb[22].mxu1 %vm1155_vm0, %v4344_v46  ;;  %3263 = vmatprep.subr.mxu1 %v3780_v40  ;;  %v2608_v0 = vrot.slane %v2607_v63, 4 }
 0xfa6   : > { %3265 = vmatprep.mubr.msk.f32.mxu1 %vm3781_vm1, %v3780_v40 }
 0xfa7   : > { %v2609_v1 = vadd.f32 %v2608_v0, %v2607_v63 }
 0xfa9   : > { %v2610_v2 = vrot.slane %v2609_v1, 2 }
 0xfab   : > { %v2611_v7 = vadd.f32 %v2610_v2, %v2609_v1 }
 0xfad   : > { %v2612_v45 = vrot.slane %v2611_v7, 1 }
 0xfaf   : > { %v2613_v29 = vadd.f32 %v2612_v45, %v2611_v7 }
 0xfb1   : > { %v2614_v13 = vmul.f32 0.05, %v2613_v29  ;;  %v2406_v29 = vmul.f32 0.05, %v4401_v23 }
0x1078   : > { %v2681_v14 = vpop.f32.mrb[22].mxu1 }
0x1079   : > { %v2682_v19 = vadd.f32 %v2681_v14, %v2614_v13  ;;  %v3257_v59 = vpop.f32.mrb[23].mxu1 }
0x107b   : > { %v2685_v9 = vsub.f32 %v2593_v53, %v2682_v19 }
0x107d   : > { %v2686_v11 = vsel %vm1155_vm0, %v2685_v9, -inf }
0x107e   : > { %2687 = vmax.xlane.f32.xlu0 %v2686_v11 }
0x110b   : > { %v2688_v15 = vpop.xlane.xlu0 %2687 }
0x110c   : > { %v2689_v24 = vsub.f32 %v2685_v9, %v2688_v15 }
0x110e   : > { %v2690_v20 = vmul.f32 1.442695, %v2689_v24 }
0x1110   : > { %3526 = vpow2.f32 %v2690_v20 }
0x111a   : > { %v3527_v5 = vpop.eup %3526 }
0x111b   : > { %v2692_v17 = vsel %vm1155_vm0, %v3527_v5, 0.0 }
0x111c   : > { %2693 = vadd.xlane.f32.xlu1 %v2692_v17 }
0x11a9   : > { %v2694_v10 = vpop.xlane.xlu1 %2693 }
0x11aa   : > { %3528 = vrcp.f32 %v2694_v10 }
0x11b4   : > { %v3529_v12 = vpop.eup %3528 }
0x11b5   : > { %v2696_v16 = vmul.f32 %v3529_v12, %v3527_v5 }
0x11b7   : > { %v2697_v18 = vsub.f32 %v2696_v16, %v4339_v27  ;;  %v3542_v16 = vld [vmem:[%s4524_s5] ss:$0 sm:$0xff] }
0x11b9   : > { %3259 = vmatpush3.msra.mxu0 %v2697_v18  ;;  %v2698_v21 = vadd.f32 %v2697_v18, %v2606_v62  ;;  %v2699_v31 = vsel %vm1155_vm0, %v2697_v18, 0.0  ;;  %v1634_v62 = vmul.f32 %v4369_v8, %v4433_v6  ;;  %v3271_v18 = vadd.f32 %v3542_v16, %v4393_v34 }
0x11ba   : > { %3261 = vmatmul.mubr.msk.f32.vlgmr.msra.gmra.mrb[24].mxu0 %vm1155_vm0, %v4344_v46  ;;  %v2700_v35 = vrot.slane %v2699_v31, 4  ;;  %v411_v46 = vlaneseq }
0x11bb   : > { %v1635_v0 = vsel %vm1155_vm0, %v1634_v62, 0.0 }
0x11bc   : > { %v2701_v36 = vadd.f32 %v2700_v35, %v2699_v31  ;;  %v4424_v49 = vand.u32 127, %v411_v46 }
0x11be   : > { %v2702_v37 = vrot.slane %v2701_v36, 2  ;;  %vm1691_vm9 = vcmp.eq.s32.totalorder %v4424_v49, 0 }
0x11c0   : > { %v2703_v39 = vadd.f32 %v2702_v37, %v2701_v36  ;;  %v3165_v36 = vld [vmem:[%s4105_s7 + $0x8] sm:$0xff] }
0x11c2   : > { %v2704_v41 = vrot.slane %v2703_v39, 1 }
0x11c4   : > { %v2705_v42 = vadd.f32 %v2704_v41, %v2703_v39 }
0x11c6   : > { %v2706_v22 = vmul.f32 0.05, %v2705_v42 }
0x128d   : > { %v2773_v25 = vpop.f32.mrb[24].mxu0 }
0x128e   : > { %v2774_v26 = vadd.f32 %v2773_v25, %v2706_v22  ;;  %v3262_v28 = vpop.f32.mrb[25].mxu0 }
0x1290   : > { %v2777_v33 = vsub.f32 %v2685_v9, %v2774_v26 }
0x1292   : > { %v2778_v38 = vsel %vm1155_vm0, %v2777_v33, -inf }
0x1293   : > { %2779 = vmax.xlane.f32.xlu0 %v2778_v38 }
0x1297   : > { %1623 = vmax.xlane.f32.xlu0 %v1622_v44 }
0x1320   : > { %v2780_v47 = vpop.xlane.xlu0 %2779 }
0x1321   : > { %v2781_v48 = vsub.f32 %v2777_v33, %v2780_v47 }
0x1323   : > { %v2782_v43 = vmul.f32 1.442695, %v2781_v48 }
0x1324   : > { %v1624_v50 = vpop.xlane.xlu0 %1623 }
0x1325   : > { %3530 = vpow2.f32 %v2782_v43  ;;  %v1625_v51 = vsub.f32 %v4369_v8, %v1624_v50  ;;  %vm1653_vm2 = vcmp.eq.f32.partialorder %v4369_v8, %v1624_v50 }
0x1326   : > { %v1654_v52 = vsel %vm1653_vm2, %v4424_v49, 8 }
0x1327   : > { %v1626_v32 = vmul.f32 1.442695, %v1625_v51  ;;  %v1655_v53 = vsel %vm1155_vm0, %v1654_v52, 2147483647 }
0x1328   : > { %v1657_v30 = vshra.s32 %v1655_v53, 16  ;;  %v1656_v4 = vand.u32 65535, %v1655_v53 }
0x1329   : > { %3532 = vpow2.f32 %v1626_v32 }
0x132a   : > { %v1659_v54 = vcvt.s32.f32 %v1657_v30  ;;  %v1658_v61 = vcvt.s32.f32 %v1656_v4 }
0x132c   : > { %1660 = vmin.xlane.f32.xlu0 %v1659_v54 }
0x132f   : > { %v3531_v55 = vpop.eup %3530 }
0x1330   : > { %v2784_v56 = vsel %vm1155_vm0, %v3531_v55, 0.0 }
0x1331   : > { %2785 = vadd.xlane.f32.xlu1 %v2784_v56 }
0x1333   : > { %v3533_v57 = vpop.eup %3532 }
0x1334   : > { %v1628_v3 = vsel %vm1155_vm0, %v3533_v57, 0.0 }
0x1335   : > { %1629 = vadd.xlane.f32.xlu0 %v1628_v3  ;;  %v1670_v3 = vcvt.s32.f32 %v4424_v49 }
0x13b9   : > { %v1661_v60 = vpop.xlane.xlu0 %1660 }
0x13ba   : > { %vm1662_vm3 = vcmp.eq.f32.partialorder %v1659_v54, %v1661_v60  ;;  %v1667_v14 = vcvt.f32.s32 %v1661_v60 }
0x13bb   : > { %v1663_v58 = vsel %vm1662_vm3, %v1658_v61, inf  ;;  %v1671_v61 = vmul.f32 %v1670_v3, %v4433_v6 }
0x13bc   : > { %1664 = vmin.xlane.f32.xlu0 %v1663_v58  ;;  %v1668_v8 = vshll.u32 %v1667_v14, 16 }
0x13bd   : > { %v1672_v62 = vsel %vm1155_vm0, %v1671_v61, 0.0 }
0x13be   : > { %v2786_v63 = vpop.xlane.xlu1 %2785 }
0x13bf   : > { %3534 = vrcp.f32 %v2786_v63  ;;  %v2919_v63 = vmul.f32 %v3165_v36, %v1670_v3 }
0x13c0   : > { %1636 = vadd.xlane.f32.xlu0 %v1635_v0 }
0x13c1   : > { %v2920_v0 = vsel %vm1155_vm0, %v2919_v63, 0.0 }
0x13c2   : > { %v1630_v13 = vpop.xlane.xlu0 %1629 }
0x13c3   : > { %3536 = vlog2.f32 %v1630_v13 }
0x13c9   : > { %v3535_v1 = vpop.eup %3534 }
0x13ca   : > { %v2788_v2 = vmul.f32 %v3535_v1, %v3531_v55 }
0x13cc   : > { %v2789_v7 = vsub.f32 %v2788_v2, %v4339_v27 }
0x13cd   : > { %v3537_v17 = vpop.eup %3536 }
0x13ce   : > { %v2790_v45 = vadd.f32 %v2789_v7, %v2698_v21  ;;  %v1632_v21 = vmul.f32 0.6931472, %v3537_v17 }
0x13d0   : > { %3264 = vmatpush3.msra.mxu1 %v2790_v45  ;;  %v2791_v11 = vsel %vm1155_vm0, %v2790_v45, 0.0  ;;  %v1633_v41 = vadd.f32 %v1632_v21, %v1624_v50 }
0x13d1   : > { %3266 = vmatmul.mubr.msk.f32.vlgmr.msra.gmra.mrb[24].mxu1 %vm1155_vm0, %v2406_v29  ;;  %v2792_v15 = vrot.slane %v2791_v11, 4 }
0x13d3   : > { %v2793_v24 = vadd.f32 %v2792_v15, %v2791_v11 }
0x13d5   : > { %v2794_v20 = vrot.slane %v2793_v24, 2 }
0x13d7   : > { %v2795_v27 = vadd.f32 %v2794_v20, %v2793_v24 }
0x13d9   : > { %v2796_v5 = vrot.slane %v2795_v27, 1 }
0x13db   : > { %v2797_v23 = vadd.f32 %v2796_v5, %v2795_v27 }
0x13dd   : > { %v2798_v10 = vmul.f32 0.05, %v2797_v23 }
0x1449   : > { %v1665_v19 = vpop.xlane.xlu0 %1664 }
0x144a   : > { %v1666_v59 = vcvt.f32.s32 %v1665_v19 }
0x144c   : > { %v4441_v9 = vadd.s32 %v1668_v8, %v1666_v59 }
0x144d   : > { %v1637_v39 = vpop.xlane.xlu0 %1636 }
0x144e   : > { %v1638_v25 = vsub.f32 %v1633_v41, %v1637_v39  ;;  %v1675_v11 = vcvt.s32.f32 %v4441_v9 }
0x1450   : > { %v1640_v28 = vsel %vm1639_vm4, %v1638_v25, 0.0 }
0x14a4   : > { %v2868_v12 = vpop.f32.mrb[24].mxu1 }
0x14a5   : > { %v2869_v31 = vadd.f32 %v2868_v12, %v2798_v10  ;;  %v3267_v35 = vpop.f32.mrb[25].mxu1 }
0x14a7   : > { %v2872_v37 = vsub.f32 %v3271_v18, %v2869_v31 }
0x14a9   : > { %v2873_v42 = vsel %vm1155_vm0, %v2872_v37, -inf  ;;  %v2885_v22 = vmul.f32 %v3165_v36, %v2872_v37 }
0x14aa   : > { %2874 = vmax.xlane.f32.xlu1 %v2873_v42 }
0x14ab   : > { %v2886_v26 = vsel %vm1155_vm0, %v2885_v22, 0.0 }
0x14ac   : > { %2887 = vadd.xlane.f32.xlu0 %v2886_v26 }
0x14b0   : > { %1641 = vadd.xlane.f32.xlu0 %v1640_v28 }
0x1537   : > { %v2875_v34 = vpop.xlane.xlu1 %2874 }
0x1538   : > { %v2876_v33 = vsub.f32 %v2872_v37, %v2875_v34  ;;  %vm2902_vm5 = vcmp.eq.f32.partialorder %v2872_v37, %v2875_v34 }
0x1539   : > { %v2888_v38 = vpop.xlane.xlu0 %2887  ;;  %v2903_v44 = vsel %vm2902_vm5, %v4424_v49, 8 }
0x153a   : > { %v2877_v46 = vmul.f32 1.442695, %v2876_v33  ;;  %v2904_v47 = vsel %vm1155_vm0, %v2903_v44, 2147483647 }
0x153b   : > { %v2906_v48 = vshra.s32 %v2904_v47, 16  ;;  %v2905_v57 = vand.u32 65535, %v2904_v47 }
0x153c   : > { %3538 = vpow2.f32 %v2877_v46 }
0x153d   : > { %v1642_v43 = vpop.xlane.xlu0 %1641  ;;  %v2908_v50 = vcvt.s32.f32 %v2906_v48  ;;  %v2907_v60 = vcvt.s32.f32 %v2905_v57 }
0x153e   : > { %v1643_v51 = vrot.slane %v1642_v43, 4 }
0x153f   : > { %2909 = vmin.xlane.f32.xlu1 %v2908_v50 }
0x1540   : > { %v1644_v52 = vadd.f32 %v1643_v51, %v1642_v43 }
0x1542   : > { %v1645_v32 = vrot.slane %v1644_v52, 2 }
0x1544   : > { %v1646_v53 = vadd.f32 %v1645_v32, %v1644_v52 }
0x1546   : > { %v3539_v30 = vpop.eup %3538  ;;  %v1647_v54 = vrot.slane %v1646_v53, 1 }
0x1547   : > { %v2879_v55 = vsel %vm1155_vm0, %v3539_v30, 0.0 }
0x1548   : > { %2880 = vadd.xlane.f32.xlu1 %v2879_v55  ;;  %v1648_v56 = vadd.f32 %v1647_v54, %v1646_v53 }
0x154a   : > { %3368 = vpush %v1648_v56 }
0x157b   : > { %s3369_s30 = spop %3368 }
0x157c   : > { %v1650_v44 = vstv %s3369_s30 }
0x157d   : > { %v1652_v47 = vmul.f32 0.125, %v1650_v44 }
0x15cc   : > { %v2910_v4 = vpop.xlane.xlu1 %2909 }
0x15cd   : > { %vm2911_vm6 = vcmp.eq.f32.partialorder %v2908_v50, %v2910_v4  ;;  %v2916_v6 = vcvt.f32.s32 %v2910_v4 }
0x15ce   : > { %v2912_v58 = vsel %vm2911_vm6, %v2907_v60, inf }
0x15cf   : > { %2913 = vmin.xlane.f32.xlu1 %v2912_v58  ;;  %v2917_v19 = vshll.u32 %v2916_v6, 16 }
0x15d3   : > { %1673 = vadd.xlane.f32.xlu1 %v1672_v62 }
0x15d5   : > { %v2881_v1 = vpop.xlane.xlu1 %2880 }
0x15d6   : > { %3540 = vlog2.f32 %v2881_v1 }
0x15d7   : > { %2921 = vadd.xlane.f32.xlu1 %v2920_v0 }
0x15e0   : > { %v3541_v2 = vpop.eup %3540 }
0x15e1   : > { %v2883_v7 = vmul.f32 0.6931472, %v3541_v2 }
0x15e3   : > { %v2884_v45 = vadd.f32 %v2883_v7, %v2875_v34 }
0x15e5   : > { %v2889_v29 = vsub.f32 %v2884_v45, %v2888_v38 }
0x15e7   : > { %v2890_v13 = vsel %vm1639_vm4, %v2889_v29, 0.0 }
0x15e8   : > { %2891 = vadd.xlane.f32.xlu0 %v2890_v13 }
0x165c   : > { %v2914_v14 = vpop.xlane.xlu1 %2913 }
0x165d   : > { %v2915_v8 = vcvt.f32.s32 %v2914_v14 }
0x165f   : > { %v2918_v59 = vadd.s32 %v2917_v19, %v2915_v8 }
0x1660   : > { %v1674_v15 = vpop.xlane.xlu1 %1673 }
0x1661   : > { %vm1676_vm7 = vcmp.eq.f32.partialorder %v1675_v11, %v1674_v15  ;;  %v2923_v20 = vcvt.s32.f32 %v2918_v59 }
0x1662   : > { %v3155_v24 = vsel %vm1676_vm7, 1.0, %v3780_v40 }
0x1663   : > { %v1679_v27 = vsel %vm1639_vm4, %v3155_v24, 0.0 }
0x1664   : > { %v2922_v5 = vpop.xlane.xlu1 %2921  ;;  %1680 = vadd.xlane.f32.xlu1 %v1679_v27 }
0x1665   : > { %vm2924_vm8 = vcmp.eq.f32.partialorder %v2923_v20, %v2922_v5 }
0x1666   : > { %v3187_v23 = vsel %vm2924_vm8, 1.0, %v3780_v40 }
0x1667   : > { %v2927_v17 = vsel %vm1639_vm4, %v3187_v23, 0.0 }
0x1668   : > { %2928 = vadd.xlane.f32.xlu1 %v2927_v17 }
0x1675   : > { %v2892_v10 = vpop.xlane.xlu0 %2891 }
0x1676   : > { %v2893_v12 = vrot.slane %v2892_v10, 4 }
0x1678   : > { %v2894_v16 = vadd.f32 %v2893_v12, %v2892_v10 }
0x167a   : > { %v2895_v18 = vrot.slane %v2894_v16, 2 }
0x167c   : > { %v2896_v35 = vadd.f32 %v2895_v18, %v2894_v16 }
0x167e   : > { %v2897_v22 = vrot.slane %v2896_v35, 1 }
0x1680   : > { %v2898_v34 = vadd.f32 %v2897_v22, %v2896_v35 }
0x16f1   : > { %v1681_v9 = vpop.xlane.xlu1 %1680 }
0x16f2   : > { %v1682_v21 = vrot.slane %v1681_v9, 4 }
0x16f4   : > { %v1683_v31 = vadd.f32 %v1682_v21, %v1681_v9 }
0x16f5   : > { %v2929_v36 = vpop.xlane.xlu1 %2928 }
0x16f6   : > { %v1684_v37 = vrot.slane %v1683_v31, 2  ;;  %v2930_v39 = vrot.slane %v2929_v36, 4 }
0x16f8   : > { %v2931_v41 = vadd.f32 %v2930_v39, %v2929_v36  ;;  %v1685_v42 = vadd.f32 %v1684_v37, %v1683_v31 }
0x16fa   : > { %v2932_v25 = vrot.slane %v2931_v41, 2  ;;  %v1686_v40 = vrot.slane %v1685_v42, 1 }
0x16fc   : > { %v2933_v26 = vadd.f32 %v2932_v25, %v2931_v41  ;;  %v1687_v28 = vadd.f32 %v1686_v40, %v1685_v42 }
0x16fe   : > { %3370 = vpush %v1687_v28  ;;  %v2934_v33 = vrot.slane %v2933_v26, 1 }
0x16ff   : > { %3372 = vpush %v2898_v34 }
0x1700   : > { %v2935_v38 = vadd.f32 %v2934_v33, %v2933_v26 }
0x1702   : > { %3374 = vpush %v2935_v38 }
0x172f   : > { %s3371_s18 = spop %3370 }
0x1730   : > { %v1689_v46 = vstv %s3371_s18  ;;  %s3373_s17 = spop %3372 }
0x1731   : > { %v1690_v48 = vmul.f32 0.125, %v1689_v46  ;;  %v2900_v43 = vstv %s3373_s17 }
0x1732   : > { %v2901_v52 = vmul.f32 0.125, %v2900_v43 }
0x1733   : > { %v1692_v50 = vsel %vm1691_vm9, %v1652_v47, %v1690_v48  ;;  %s3375_s14 = spop %3374 }
0x1734   : > { %v2937_v51 = vstv %s3375_s14  ;;  %1694 = vst.msk [vmem:[%s400_s10] sm:$0x1] %vm1693_vm10, %v1692_v50 }
0x1735   : > { %v2938_v32 = vmul.f32 0.125, %v2937_v51 }
0x1737   : > { %v2939_v53 = vsel %vm1691_vm9, %v2901_v52, %v2938_v32 }
0x1738   : > { %2940 = vst.msk [vmem:[%s400_s10 + $0x1] sm:$0x1] %vm1693_vm10, %v2939_v53 }
0x1739   : > { %3704 = shalt.err (!%p3701_p13)
}
0x173a   : > { %s3705_s19 = scalar_lea.hbm %s4473_s4, 32  ;;  %s3709_s8 = scalar_lea.hbm %s4525_s6, 64 }
0x173b   : > { %p3706_p3 = scmp.ne.s32.totalorder %s4473_s4, %s3705_s19  ;;  %p3710_p7 = scmp.lt.u32.totalorder %s4473_s4, %s4525_s6 }
0x173c   : > { %p3711_p11 = scmp.lt.u32.totalorder %s3709_s8, %s3705_s19  ;;  %p3713_p10 = scmp.lt.u32.totalorder %s3705_s19, %s4473_s4 }
0x173d   : > { %p3707_p1 = pnand %p3706_p3, %p4567_p2 }
0x173e   : > { %p3712_p8 = por %p3711_p11, %p3710_p7 }
0x173f   : > { %p3708_p12 = pneg %p3707_p1 }
0x1740   : > { %p3714_p9 = por %p3713_p10, %p3712_p8 }
0x1742   : > { %p3715_p4 = pnand %p3714_p9, %p3708_p12 }
0x1744   : > { %3718 = shalt.err (!%p3715_p4)
}
0x1745   : > { %3388 = dma.vmem_to_hbm [thread:$0]  (%p4567_p2), %s4475_s12, 32, %s4473_s4, %s2942_s25  }
0x1746 PF: > { %s4568_s20 = sld [smem:[#allocation17_spill]]  ;;  %s4569_s30 = sld [smem:[#allocation21_spill]] }
0x1747   : > { %p4571_p6 = scmp.ge.s32.totalorder %s3769_s24, 2 }
0x174c   : > { %s2967_s15 = sand.u32 1, %s4568_s20   ;;  %p4570_p0 = scmp.ne.s32.totalorder %s4569_s30, 0 }
0x174d   : > { %s2968_s18 = scalar_lea.sflag [#allocation4], %s2967_s15 }
0x174e   : > { %p3408_p5 = pnand %p4571_p6, %p4570_p0 }
0x1750   : > { %3752 = dma.done.wait (!%p3408_p5), %s2968_s18, 32  }
0x1751   : > { %3754 = vsyncadd (!%p3408_p5), %s2968_s18, 4294967264  ;;  %s4572_s24 = sld [smem:[#allocation19_spill]]  ;;  %s4573_s17 = sld [smem:[#allocation18_spill]] }
0x1752   : > { %s4574_s23 = sld [smem:[#allocation20_spill]]  ;;  %s4575_s21 = smov %s3761_s22 }
0x1757   : > { %p25_p13 = scmp.ge.s32.totalorder %s4572_s24, 4   ;;  %s4576_s22 = smov %s4573_s17 }
0x1759   :  { %27 = sbr.rel (!%p25_p13) target bundleno = 12 (0xc), region = 134 }
0x1760   :  { %2973 = vsyncpa [#allocation3], 1 }
0x1761   :  { %2975 = vsyncpa [#allocation3 + $0x1], 1 }
0x1762   :  { %2976 = vsyncpa [#allocation6], 1 }
0x1763   :  { %2978 = vsyncpa [#allocation6 + $0x1], 1 }
0x1764   :  { %2979 = vsyncpa [#allocation9], 1 }
0x1765   :  { %2981 = vsyncpa [#allocation9 + $0x1], 1 }
0x1766   :  { %2982 = vsyncpa [#allocation4], 1 }
0x1767   :  { %2984 = vsyncpa [#allocation4 + $0x1], 1 }

</bundles_post_ra>
